<compile_context>
chip_gen: v6e
topology: v6e:2x2x1
jax: 0.10.0
libtpu: 0.0.40
codegen_flags: <defaults>
</compile_context>

<pallas_src>
import functools

import jax
import jax.numpy as jnp
from jax import lax
from jax.experimental import pallas as pl
from jax.experimental.pallas import tpu as pltpu

LANE = 128
_F32 = jnp.float32
_BF16 = jnp.bfloat16


def _round_up(x, m):
    return (x + m - 1) // m * m


# -----------------------------------------------------------------------------
# Fused kernel: one (TM, Dp) tile of query rows of a single batch element.
# K^T / V for that batch are precomputed in the wrapper and arrive in bf16.
# -----------------------------------------------------------------------------
def _backbone_kernel(h_ref, kT_ref, v_ref,
                     wq_ref, wo_ref,
                     ln1g_ref, ln1b_ref, ln2g_ref, ln2b_ref,
                     w1_ref, b1_ref, w2_ref, b2_ref,
                     o_ref, *, dim, skv):
    f32 = _F32
    bf16 = _BF16
    inv_d = f32(1.0 / dim)

    h = h_ref[0].astype(f32)        # (TM, Dp)   query-row tile
    kT = kT_ref[0]                  # (Dp, Skv_p) bf16, pre-transposed keys
    v = v_ref[0]                    # (Skv_p, Dp) bf16 values

    dp = h.shape[-1]
    skv_p = kT.shape[-1]

    # Padded feature lanes are zero; keep them out of the centered variance so
    # LayerNorm statistics match the unpadded ones exactly.
    feat_mask = None
    if dim != dp:
        feat_mask = lax.broadcasted_iota(jnp.int32, (1, dp), 1) < dim

    def layer_norm(x, g, b):
        mu = jnp.sum(x, axis=-1, keepdims=True) * inv_d
        xc = x - mu
        if feat_mask is not None:
            xc = jnp.where(feat_mask, xc, f32(0.0))
        var = jnp.sum(xc * xc, axis=-1, keepdims=True) * inv_d
        return xc * lax.rsqrt(var + f32(1e-5)) * g + b

    # ---- pre-LN (1) + single-head cross-attention (bf16 MXU, f32 acc) -------
    hn = layer_norm(h, ln1g_ref[...], ln1b_ref[...])
    scale = f32(1.0 / (float(dim) ** 0.5))
    q = jnp.dot(hn.astype(bf16), wq_ref[...], preferred_element_type=f32)
    scores = jnp.dot((q * scale).astype(bf16), kT,
                     preferred_element_type=f32)              # (TM, Skv_p)

    if skv != skv_p:                                          # mask padded keys
        kmask = lax.broadcasted_iota(jnp.int32, scores.shape, 1) < skv
        scores = jnp.where(kmask, scores, f32(-1e30))

    m = jnp.max(scores, axis=-1, keepdims=True)
    p = jnp.exp(scores - m)
    denom = jnp.sum(p, axis=-1, keepdims=True)
    ctx = jnp.dot(p.astype(bf16), v, preferred_element_type=f32)
    ctx = ctx * pl.reciprocal(denom, approx=True)             # EUP slot

    h = h + jnp.dot(ctx.astype(bf16), wo_ref[...], preferred_element_type=f32)

    # ---- pre-LN (2) + GELU MLP ----------------------------------------------
    hn2 = layer_norm(h, ln2g_ref[...], ln2b_ref[...])
    f = jnp.dot(hn2.astype(bf16), w1_ref[...], preferred_element_type=f32)
    f = f + b1_ref[...]
    # TODO(synk): PyTorch nn.GELU default is exact erf; tanh approximation kept
    #             here (EUP tanh) for guaranteed Mosaic lowering.
    f = jax.nn.gelu(f)
    h = h + jnp.dot(f.astype(bf16), w2_ref[...], preferred_element_type=f32)
    h = h + b2_ref[...]

    o_ref[0] = h.astype(o_ref.dtype)


def _vmem_limit_bytes():
    cap = 64 * 1024 * 1024
    try:
        cap = int(pltpu.get_tpu_info().vmem_capacity_bytes)
    except Exception:
        pass
    # ~16 MiB headroom: ≈48 MiB on v7x (64 MiB VMEM), ≈112 MiB on v5e/v6e (128).
    return int(min(max(cap - 16 * 1024 * 1024, 32 * 1024 * 1024),
                   112 * 1024 * 1024))


def _run_pallas(h3, kT3, v3, params, *, dim, skv, tm, single_buffer):
    B, sq_p, dp = h3.shape
    skv_p = kT3.shape[-1]
    hp = params["w1"].shape[-1]
    n_tiles = sq_p // tm

    def const_spec(arr):
        # Entire parameter resident in VMEM, same block every grid step.
        if single_buffer:
            return pl.BlockSpec(arr.shape, lambda b, i: (0,) * arr.ndim,
                                pipeline_mode=pl.Buffered(1))
        return pl.BlockSpec(arr.shape, lambda b, i: (0,) * arr.ndim)

    def kv_spec(shape):
        # Per-batch K^T / V: index changes only when the batch index changes.
        if single_buffer:
            return pl.BlockSpec((1,) + shape, lambda b, i: (b, 0, 0),
                                pipeline_mode=pl.Buffered(1))
        return pl.BlockSpec((1,) + shape, lambda b, i: (b, 0, 0))

    w_order = ("wq", "wo", "ln1g", "ln1b", "ln2g", "ln2b",
               "w1", "b1", "w2", "b2")
    w_args = tuple(params[k] for k in w_order)

    in_specs = [
        pl.BlockSpec((1, tm, dp), lambda b, i: (b, i, 0)),    # query row tile
        kv_spec((dp, skv_p)),                                 # K^T (bf16)
        kv_spec((skv_p, dp)),                                 # V   (bf16)
    ] + [const_spec(w) for w in w_args]

    out_specs = pl.BlockSpec((1, tm, dp), lambda b, i: (b, i, 0))

    rows = B * sq_p
    flops = 4 * rows * dp * (dp + skv_p + hp)
    transcendentals = rows * (skv_p + hp)
    bytes_accessed = (2 * rows * dp * 4                        # h in + out (f32)
                      + 2 * B * skv_p * dp * 2                 # K^T + V (bf16)
                      + sum(int(w.size) * w.dtype.itemsize for w in w_args))

    kernel = functools.partial(_backbone_kernel, dim=dim, skv=skv)

    return pl.pallas_call(
        kernel,
        out_shape=jax.ShapeDtypeStruct((B, sq_p, dp), jnp.float32),
        grid_spec=pltpu.PrefetchScalarGridSpec(
            num_scalar_prefetch=0,
            grid=(B, n_tiles),
            in_specs=in_specs,
            out_specs=out_specs,
        ),
        compiler_params=pltpu.CompilerParams(
            dimension_semantics=("parallel", "parallel"),
            vmem_limit_bytes=_vmem_limit_bytes(),
        ),
        cost_estimate=pl.CostEstimate(
            flops=int(flops),
            transcendentals=int(transcendentals),
            bytes_accessed=int(bytes_accessed),
        ),
    )(h3, kT3, v3, *w_args)


def backbone_wrapper_forward(hidden_states, encoder_hidden_states, params):
    """JAX/Pallas equivalent of BackboneWrapper.forward.

    hidden_states:         (B, Sq, D)  float32
    encoder_hidden_states: (B, Skv, D) float32
    returns:               (B, Sq, D)  float32
    """
    B, Sq, D = hidden_states.shape
    Be, Skv, De = encoder_hidden_states.shape
    assert Be == B and De == D

    dp = params["wq"].shape[0]
    assert dp == _round_up(D, LANE)
    skv_p = _round_up(Skv, LANE)
    tm = min(512, _round_up(Sq, 8))
    sq_p = _round_up(Sq, tm)

    # activations: pad seq rows + feature lanes; hidden states stay f32
    h3 = jnp.pad(hidden_states, ((0, 0), (0, sq_p - Sq), (0, dp - D)))

    # ---- K/V projection hoisted out of the kernel grid loop (bf16 inputs) ---
    e_bf = jnp.pad(encoder_hidden_states,
                   ((0, 0), (0, 0), (0, dp - D))).astype(_BF16)
    k = jnp.einsum("bsd,de->bse", e_bf, params["wk"],
                   preferred_element_type=_F32)
    v = jnp.einsum("bsd,de->bse", e_bf, params["wv"],
                   preferred_element_type=_F32)
    kT3 = jnp.pad(jnp.swapaxes(k, 1, 2).astype(_BF16),
                  ((0, 0), (0, 0), (0, skv_p - Skv)))
    v3 = jnp.pad(v.astype(_BF16), ((0, 0), (0, skv_p - Skv), (0, 0)))

    try:
        out = _run_pallas(h3, kT3, v3, params, dim=D, skv=Skv, tm=tm,
                          single_buffer=True)
        out = jax.block_until_ready(out)
    except Exception:
        # TODO(synk): pl.Buffered(1) single-buffering not accepted by this JAX
        #             build -> fall back to default double-buffered specs.
        out = _run_pallas(h3, kT3, v3, params, dim=D, skv=Skv, tm=tm,
                          single_buffer=False)

    return out[:, :Sq, :D]


def init_backbone_params(key, dim, hidden_mult=4):
    """Deterministic synthetic backbone weights, pre-padded to lane-dense
    shapes and pre-cast to bf16 once (not on every forward call)."""
    hid = dim * hidden_mult
    dp = _round_up(dim, LANE)
    hp = _round_up(hid, LANE)
    ks = jax.random.split(key, 6)
    s = 0.05

    def pad2(x, r, c):
        return jnp.pad(x, ((0, r - x.shape[0]), (0, c - x.shape[1])))

    wq = s * jax.random.normal(ks[0], (dim, dim), _F32)
    wk = s * jax.random.normal(ks[1], (dim, dim), _F32)
    wv = s * jax.random.normal(ks[2], (dim, dim), _F32)
    wo = s * jax.random.normal(ks[3], (dim, dim), _F32)
    w1 = s * jax.random.normal(ks[4], (dim, hid), _F32)
    w2 = s * jax.random.normal(ks[5], (hid, dim), _F32)

    return {
        "wq": pad2(wq, dp, dp).astype(_BF16),
        "wk": pad2(wk, dp, dp).astype(_BF16),   # only used wrapper-side (K)
        "wv": pad2(wv, dp, dp).astype(_BF16),   # only used wrapper-side (V)
        "wo": pad2(wo, dp, dp).astype(_BF16),
        "ln1g": pad2(jnp.ones((1, dim), _F32), 1, dp),
        "ln1b": jnp.zeros((1, dp), _F32),
        "ln2g": pad2(jnp.ones((1, dim), _F32), 1, dp),
        "ln2b": jnp.zeros((1, dp), _F32),
        "w1": pad2(w1, dp, hp).astype(_BF16),
        "b1": jnp.zeros((1, hp), _F32),
        "w2": pad2(w2, hp, dp).astype(_BF16),
        "b2": jnp.zeros((1, dp), _F32),
    }


if __name__ == "__main__":
    B, Sq, Skv, D = 2, 16, 8, 32

    key = jax.random.PRNGKey(0)
    k_h, k_e, k_p = jax.random.split(key, 3)

    hidden_states = jax.random.normal(k_h, (B, Sq, D), _F32)
    encoder_hidden_states = jax.random.normal(k_e, (B, Skv, D), _F32)
    params = init_backbone_params(k_p, D)

    out = backbone_wrapper_forward(hidden_states, encoder_hidden_states, params)
    out = jax.block_until_ready(out)

    assert out.shape == (B, Sq, D) and out.dtype == jnp.float32
    assert bool(jnp.all(jnp.isfinite(out)))
    print("KERNEL_OK")
</pallas_src>

<mosaic_0001>
module attributes {stable_mosaic.version = 11 : i64} {
  func.func @_backbone_kernel(%arg0: i32, %arg1: i32, %arg2: memref<1x16x128xf32, #tpu.memory_space<vmem>>, %arg3: memref<1x128x128xbf16, #tpu.memory_space<vmem>>, %arg4: memref<1x128x128xbf16, #tpu.memory_space<vmem>>, %arg5: memref<128x128xbf16, #tpu.memory_space<vmem>>, %arg6: memref<128x128xbf16, #tpu.memory_space<vmem>>, %arg7: memref<1x128xf32, #tpu.memory_space<vmem>>, %arg8: memref<1x128xf32, #tpu.memory_space<vmem>>, %arg9: memref<1x128xf32, #tpu.memory_space<vmem>>, %arg10: memref<1x128xf32, #tpu.memory_space<vmem>>, %arg11: memref<128x128xbf16, #tpu.memory_space<vmem>>, %arg12: memref<1x128xf32, #tpu.memory_space<vmem>>, %arg13: memref<128x128xbf16, #tpu.memory_space<vmem>>, %arg14: memref<1x128xf32, #tpu.memory_space<vmem>>, %arg15: memref<1x16x128xf32, #tpu.memory_space<vmem>>) attributes {dimension_semantics = [#tpu.dimension_semantics<parallel>, #tpu.dimension_semantics<parallel>], iteration_bounds = array<i64: 2, 1>, scalar_prefetch = 0 : i64, scratch_operands = 0 : i64, tpu.core_type = #tpu.core_type<tc>, window_params = [{transform_indices = @transform_0, window_bounds = array<i64: 1, 16, 128>}, {pipeline_mode = #tpu.pipeline_mode<synchronous>, transform_indices = @transform_1, window_bounds = array<i64: 1, 128, 128>}, {pipeline_mode = #tpu.pipeline_mode<synchronous>, transform_indices = @transform_2, window_bounds = array<i64: 1, 128, 128>}, {pipeline_mode = #tpu.pipeline_mode<synchronous>, transform_indices = @transform_3, window_bounds = array<i64: 128, 128>}, {pipeline_mode = #tpu.pipeline_mode<synchronous>, transform_indices = @transform_4, window_bounds = array<i64: 128, 128>}, {pipeline_mode = #tpu.pipeline_mode<synchronous>, transform_indices = @transform_5, window_bounds = array<i64: 1, 128>}, {pipeline_mode = #tpu.pipeline_mode<synchronous>, transform_indices = @transform_6, window_bounds = array<i64: 1, 128>}, {pipeline_mode = #tpu.pipeline_mode<synchronous>, transform_indices = @transform_7, window_bounds = array<i64: 1, 128>}, {pipeline_mode = #tpu.pipeline_mode<synchronous>, transform_indices = @transform_8, window_bounds = array<i64: 1, 128>}, {pipeline_mode = #tpu.pipeline_mode<synchronous>, transform_indices = @transform_9, window_bounds = array<i64: 128, 128>}, {pipeline_mode = #tpu.pipeline_mode<synchronous>, transform_indices = @transform_10, window_bounds = array<i64: 1, 128>}, {pipeline_mode = #tpu.pipeline_mode<synchronous>, transform_indices = @transform_11, window_bounds = array<i64: 128, 128>}, {pipeline_mode = #tpu.pipeline_mode<synchronous>, transform_indices = @transform_12, window_bounds = array<i64: 1, 128>}, {transform_indices = @transform_13, window_bounds = array<i64: 1, 16, 128>}]} {
    %c0 = arith.constant 0 : index
    %c0_0 = arith.constant 0 : index
    %c0_1 = arith.constant 0 : index
    %0 = vector.load %arg2[%c0, %c0_0, %c0_1] : memref<1x16x128xf32, #tpu.memory_space<vmem>>, vector<1x16x128xf32>
    %1 = vector.shape_cast %0 : vector<1x16x128xf32> to vector<16x128xf32>
    %c0_2 = arith.constant 0 : index
    %c0_3 = arith.constant 0 : index
    %c0_4 = arith.constant 0 : index
    %2 = vector.load %arg3[%c0_2, %c0_3, %c0_4] : memref<1x128x128xbf16, #tpu.memory_space<vmem>>, vector<1x128x128xbf16>
    %3 = vector.shape_cast %2 : vector<1x128x128xbf16> to vector<128x128xbf16>
    %c0_5 = arith.constant 0 : index
    %c0_6 = arith.constant 0 : index
    %c0_7 = arith.constant 0 : index
    %4 = vector.load %arg4[%c0_5, %c0_6, %c0_7] : memref<1x128x128xbf16, #tpu.memory_space<vmem>>, vector<1x128x128xbf16>
    %5 = vector.shape_cast %4 : vector<1x128x128xbf16> to vector<128x128xbf16>
    %6 = tpu.iota {dimensions = array<i32: 1>} : vector<1x128xi32>
    %c32_i32 = arith.constant 32 : i32
    %7 = vector.broadcast %c32_i32 : i32 to vector<1x128xi32>
    %8 = arith.cmpi slt, %6, %7 : vector<1x128xi32>
    %c0_8 = arith.constant 0 : index
    %c0_9 = arith.constant 0 : index
    %9 = vector.load %arg7[%c0_8, %c0_9] : memref<1x128xf32, #tpu.memory_space<vmem>>, vector<1x128xf32>
    %c0_10 = arith.constant 0 : index
    %c0_11 = arith.constant 0 : index
    %10 = vector.load %arg8[%c0_10, %c0_11] : memref<1x128xf32, #tpu.memory_space<vmem>>, vector<1x128xf32>
    %cst = arith.constant dense<0.000000e+00> : vector<16xf32>
    %11 = vector.multi_reduction <add>, %1, %cst [1] : vector<16x128xf32> to vector<16xf32>
    %12 = vector.shape_cast %11 : vector<16xf32> to vector<16x1xf32>
    %cst_12 = arith.constant 3.125000e-02 : f32
    %13 = vector.broadcast %cst_12 : f32 to vector<16x1xf32>
    %14 = arith.mulf %12, %13 : vector<16x1xf32>
    %15 = vector.broadcast %14 : vector<16x1xf32> to vector<16x128xf32>
    %16 = arith.subf %1, %15 : vector<16x128xf32>
    %cst_13 = arith.constant 0.000000e+00 : f32
    %17 = vector.shape_cast %8 : vector<1x128xi1> to vector<1x128xi1>
    %18 = vector.broadcast %17 : vector<1x128xi1> to vector<16x128xi1>
    %19 = vector.broadcast %cst_13 : f32 to vector<16x128xf32>
    %20 = arith.select %18, %16, %19 : vector<16x128xi1>, vector<16x128xf32>
    %21 = arith.mulf %20, %20 : vector<16x128xf32>
    %cst_14 = arith.constant dense<0.000000e+00> : vector<16xf32>
    %22 = vector.multi_reduction <add>, %21, %cst_14 [1] : vector<16x128xf32> to vector<16xf32>
    %23 = vector.shape_cast %22 : vector<16xf32> to vector<16x1xf32>
    %cst_15 = arith.constant 3.125000e-02 : f32
    %24 = vector.broadcast %cst_15 : f32 to vector<16x1xf32>
    %25 = arith.mulf %23, %24 : vector<16x1xf32>
    %cst_16 = arith.constant 9.99999974E-6 : f32
    %26 = vector.broadcast %cst_16 : f32 to vector<16x1xf32>
    %27 = arith.addf %25, %26 : vector<16x1xf32>
    %28 = math.rsqrt %27 : vector<16x1xf32>
    %29 = vector.broadcast %28 : vector<16x1xf32> to vector<16x128xf32>
    %30 = arith.mulf %20, %29 : vector<16x128xf32>
    %31 = vector.broadcast %9 : vector<1x128xf32> to vector<16x128xf32>
    %32 = arith.mulf %30, %31 : vector<16x128xf32>
    %33 = vector.broadcast %10 : vector<1x128xf32> to vector<16x128xf32>
    %34 = arith.addf %32, %33 : vector<16x128xf32>
    %35 = arith.truncf %34 : vector<16x128xf32> to vector<16x128xbf16>
    %c0_17 = arith.constant 0 : index
    %c0_18 = arith.constant 0 : index
    %36 = vector.load %arg5[%c0_17, %c0_18] : memref<128x128xbf16, #tpu.memory_space<vmem>>, vector<128x128xbf16>
    %cst_19 = arith.constant dense<0.000000e+00> : vector<16x128xf32>
    %37 = tpu.matmul %35, %36, %cst_19 {dimension_numbers = #tpu.dot_dimension_numbers<[1], [0], [0], [1], [0, 0, 1, 1], [], []>} : vector<16x128xbf16>, vector<128x128xbf16>, vector<16x128xf32> -> vector<16x128xf32>
    %cst_20 = arith.constant 0.176776692 : f32
    %38 = vector.broadcast %cst_20 : f32 to vector<16x128xf32>
    %39 = arith.mulf %37, %38 : vector<16x128xf32>
    %40 = arith.truncf %39 : vector<16x128xf32> to vector<16x128xbf16>
    %cst_21 = arith.constant dense<0.000000e+00> : vector<16x128xf32>
    %41 = tpu.matmul %40, %3, %cst_21 {dimension_numbers = #tpu.dot_dimension_numbers<[1], [0], [0], [1], [0, 0, 1, 1], [], []>} : vector<16x128xbf16>, vector<128x128xbf16>, vector<16x128xf32> -> vector<16x128xf32>
    %42 = tpu.iota {dimensions = array<i32: 1>} : vector<16x128xi32>
    %c8_i32 = arith.constant 8 : i32
    %43 = vector.broadcast %c8_i32 : i32 to vector<16x128xi32>
    %44 = arith.cmpi slt, %42, %43 : vector<16x128xi32>
    %cst_22 = arith.constant -1.000000e+30 : f32
    %45 = vector.broadcast %cst_22 : f32 to vector<16x128xf32>
    %46 = arith.select %44, %41, %45 : vector<16x128xi1>, vector<16x128xf32>
    %cst_23 = arith.constant dense<0xFF800000> : vector<16xf32>
    %47 = vector.multi_reduction <maximumf>, %46, %cst_23 [1] : vector<16x128xf32> to vector<16xf32>
    %48 = vector.shape_cast %47 : vector<16xf32> to vector<16x1xf32>
    %49 = vector.broadcast %48 : vector<16x1xf32> to vector<16x128xf32>
    %50 = arith.subf %46, %49 : vector<16x128xf32>
    %51 = math.exp %50 : vector<16x128xf32>
    %cst_24 = arith.constant dense<0.000000e+00> : vector<16xf32>
    %52 = vector.multi_reduction <add>, %51, %cst_24 [1] : vector<16x128xf32> to vector<16xf32>
    %53 = vector.shape_cast %52 : vector<16xf32> to vector<16x1xf32>
    %54 = arith.truncf %51 : vector<16x128xf32> to vector<16x128xbf16>
    %cst_25 = arith.constant dense<0.000000e+00> : vector<16x128xf32>
    %55 = tpu.matmul %54, %5, %cst_25 {dimension_numbers = #tpu.dot_dimension_numbers<[1], [0], [0], [1], [0, 0, 1, 1], [], []>} : vector<16x128xbf16>, vector<128x128xbf16>, vector<16x128xf32> -> vector<16x128xf32>
    %56 = tpu.reciprocal %53 {approx = true} : vector<16x1xf32> -> vector<16x1xf32>
    %57 = vector.broadcast %56 : vector<16x1xf32> to vector<16x128xf32>
    %58 = arith.mulf %55, %57 : vector<16x128xf32>
    %59 = arith.truncf %58 : vector<16x128xf32> to vector<16x128xbf16>
    %c0_26 = arith.constant 0 : index
    %c0_27 = arith.constant 0 : index
    %60 = vector.load %arg6[%c0_26, %c0_27] : memref<128x128xbf16, #tpu.memory_space<vmem>>, vector<128x128xbf16>
    %cst_28 = arith.constant dense<0.000000e+00> : vector<16x128xf32>
    %61 = tpu.matmul %59, %60, %cst_28 {dimension_numbers = #tpu.dot_dimension_numbers<[1], [0], [0], [1], [0, 0, 1, 1], [], []>} : vector<16x128xbf16>, vector<128x128xbf16>, vector<16x128xf32> -> vector<16x128xf32>
    %62 = arith.addf %1, %61 : vector<16x128xf32>
    %c0_29 = arith.constant 0 : index
    %c0_30 = arith.constant 0 : index
    %63 = vector.load %arg9[%c0_29, %c0_30] : memref<1x128xf32, #tpu.memory_space<vmem>>, vector<1x128xf32>
    %c0_31 = arith.constant 0 : index
    %c0_32 = arith.constant 0 : index
    %64 = vector.load %arg10[%c0_31, %c0_32] : memref<1x128xf32, #tpu.memory_space<vmem>>, vector<1x128xf32>
    %cst_33 = arith.constant dense<0.000000e+00> : vector<16xf32>
    %65 = vector.multi_reduction <add>, %62, %cst_33 [1] : vector<16x128xf32> to vector<16xf32>
    %66 = vector.shape_cast %65 : vector<16xf32> to vector<16x1xf32>
    %cst_34 = arith.constant 3.125000e-02 : f32
    %67 = vector.broadcast %cst_34 : f32 to vector<16x1xf32>
    %68 = arith.mulf %66, %67 : vector<16x1xf32>
    %69 = vector.broadcast %68 : vector<16x1xf32> to vector<16x128xf32>
    %70 = arith.subf %62, %69 : vector<16x128xf32>
    %cst_35 = arith.constant 0.000000e+00 : f32
    %71 = vector.shape_cast %8 : vector<1x128xi1> to vector<1x128xi1>
    %72 = vector.broadcast %71 : vector<1x128xi1> to vector<16x128xi1>
    %73 = vector.broadcast %cst_35 : f32 to vector<16x128xf32>
    %74 = arith.select %72, %70, %73 : vector<16x128xi1>, vector<16x128xf32>
    %75 = arith.mulf %74, %74 : vector<16x128xf32>
    %cst_36 = arith.constant dense<0.000000e+00> : vector<16xf32>
    %76 = vector.multi_reduction <add>, %75, %cst_36 [1] : vector<16x128xf32> to vector<16xf32>
    %77 = vector.shape_cast %76 : vector<16xf32> to vector<16x1xf32>
    %cst_37 = arith.constant 3.125000e-02 : f32
    %78 = vector.broadcast %cst_37 : f32 to vector<16x1xf32>
    %79 = arith.mulf %77, %78 : vector<16x1xf32>
    %cst_38 = arith.constant 9.99999974E-6 : f32
    %80 = vector.broadcast %cst_38 : f32 to vector<16x1xf32>
    %81 = arith.addf %79, %80 : vector<16x1xf32>
    %82 = math.rsqrt %81 : vector<16x1xf32>
    %83 = vector.broadcast %82 : vector<16x1xf32> to vector<16x128xf32>
    %84 = arith.mulf %74, %83 : vector<16x128xf32>
    %85 = vector.broadcast %63 : vector<1x128xf32> to vector<16x128xf32>
    %86 = arith.mulf %84, %85 : vector<16x128xf32>
    %87 = vector.broadcast %64 : vector<1x128xf32> to vector<16x128xf32>
    %88 = arith.addf %86, %87 : vector<16x128xf32>
    %89 = arith.truncf %88 : vector<16x128xf32> to vector<16x128xbf16>
    %c0_39 = arith.constant 0 : index
    %c0_40 = arith.constant 0 : index
    %90 = vector.load %arg11[%c0_39, %c0_40] : memref<128x128xbf16, #tpu.memory_space<vmem>>, vector<128x128xbf16>
    %cst_41 = arith.constant dense<0.000000e+00> : vector<16x128xf32>
    %91 = tpu.matmul %89, %90, %cst_41 {dimension_numbers = #tpu.dot_dimension_numbers<[1], [0], [0], [1], [0, 0, 1, 1], [], []>} : vector<16x128xbf16>, vector<128x128xbf16>, vector<16x128xf32> -> vector<16x128xf32>
    %c0_42 = arith.constant 0 : index
    %c0_43 = arith.constant 0 : index
    %92 = vector.load %arg12[%c0_42, %c0_43] : memref<1x128xf32, #tpu.memory_space<vmem>>, vector<1x128xf32>
    %93 = vector.broadcast %92 : vector<1x128xf32> to vector<16x128xf32>
    %94 = arith.addf %91, %93 : vector<16x128xf32>
    %95 = arith.mulf %94, %94 : vector<16x128xf32>
    %96 = arith.mulf %94, %95 : vector<16x128xf32>
    %cst_44 = arith.constant 4.471500e-02 : f32
    %97 = vector.broadcast %cst_44 : f32 to vector<16x128xf32>
    %98 = arith.mulf %97, %96 : vector<16x128xf32>
    %99 = arith.addf %94, %98 : vector<16x128xf32>
    %cst_45 = arith.constant 0.797884583 : f32
    %100 = vector.broadcast %cst_45 : f32 to vector<16x128xf32>
    %101 = arith.mulf %100, %99 : vector<16x128xf32>
    %102 = math.tanh %101 : vector<16x128xf32>
    %cst_46 = arith.constant 1.000000e+00 : f32
    %103 = vector.broadcast %cst_46 : f32 to vector<16x128xf32>
    %104 = arith.addf %103, %102 : vector<16x128xf32>
    %cst_47 = arith.constant 5.000000e-01 : f32
    %105 = vector.broadcast %cst_47 : f32 to vector<16x128xf32>
    %106 = arith.mulf %105, %104 : vector<16x128xf32>
    %107 = arith.mulf %94, %106 : vector<16x128xf32>
    %108 = arith.truncf %107 : vector<16x128xf32> to vector<16x128xbf16>
    %c0_48 = arith.constant 0 : index
    %c0_49 = arith.constant 0 : index
    %109 = vector.load %arg13[%c0_48, %c0_49] : memref<128x128xbf16, #tpu.memory_space<vmem>>, vector<128x128xbf16>
    %cst_50 = arith.constant dense<0.000000e+00> : vector<16x128xf32>
    %110 = tpu.matmul %108, %109, %cst_50 {dimension_numbers = #tpu.dot_dimension_numbers<[1], [0], [0], [1], [0, 0, 1, 1], [], []>} : vector<16x128xbf16>, vector<128x128xbf16>, vector<16x128xf32> -> vector<16x128xf32>
    %111 = arith.addf %62, %110 : vector<16x128xf32>
    %c0_51 = arith.constant 0 : index
    %c0_52 = arith.constant 0 : index
    %112 = vector.load %arg14[%c0_51, %c0_52] : memref<1x128xf32, #tpu.memory_space<vmem>>, vector<1x128xf32>
    %113 = vector.broadcast %112 : vector<1x128xf32> to vector<16x128xf32>
    %114 = arith.addf %111, %113 : vector<16x128xf32>
    %c0_53 = arith.constant 0 : index
    %c0_54 = arith.constant 0 : index
    %c0_55 = arith.constant 0 : index
    %115 = vector.load %arg15[%c0_53, %c0_54, %c0_55] : memref<1x16x128xf32, #tpu.memory_space<vmem>>, vector<1x16x128xf32>
    %116 = vector.shape_cast %115 : vector<1x16x128xf32> to vector<16x128xf32>
    %117 = vector.shape_cast %114 : vector<16x128xf32> to vector<1x16x128xf32>
    tpu.vector_store %arg15[%c0_53, %c0_54, %c0_55], %117 {strides = array<i32>} : memref<1x16x128xf32, #tpu.memory_space<vmem>>, vector<1x16x128xf32>,
    return
  }
  func.func @transform_0(%arg0: i32, %arg1: i32) -> (i32, i32, i32) {
    %c0_i32 = arith.constant 0 : i32
    %c0_i32_0 = arith.constant 0 : i32
    return %arg0, %arg1, %c0_i32 : i32, i32, i32
  }
  func.func @transform_1(%arg0: i32, %arg1: i32) -> (i32, i32, i32) {
    %c0_i32 = arith.constant 0 : i32
    %c0_i32_0 = arith.constant 0 : i32
    %c0_i32_1 = arith.constant 0 : i32
    return %arg0, %c0_i32, %c0_i32_0 : i32, i32, i32
  }
  func.func @transform_2(%arg0: i32, %arg1: i32) -> (i32, i32, i32) {
    %c0_i32 = arith.constant 0 : i32
    %c0_i32_0 = arith.constant 0 : i32
    %c0_i32_1 = arith.constant 0 : i32
    return %arg0, %c0_i32, %c0_i32_0 : i32, i32, i32
  }
  func.func @transform_3(%arg0: i32, %arg1: i32) -> (i32, i32) {
    %c0_i32 = arith.constant 0 : i32
    %c0_i32_0 = arith.constant 0 : i32
    %c0_i32_1 = arith.constant 0 : i32
    return %c0_i32, %c0_i32_0 : i32, i32
  }
  func.func @transform_4(%arg0: i32, %arg1: i32) -> (i32, i32) {
    %c0_i32 = arith.constant 0 : i32
    %c0_i32_0 = arith.constant 0 : i32
    %c0_i32_1 = arith.constant 0 : i32
    return %c0_i32, %c0_i32_0 : i32, i32
  }
  func.func @transform_5(%arg0: i32, %arg1: i32) -> (i32, i32) {
    %c0_i32 = arith.constant 0 : i32
    %c0_i32_0 = arith.constant 0 : i32
    %c0_i32_1 = arith.constant 0 : i32
    return %c0_i32, %c0_i32_0 : i32, i32
  }
  func.func @transform_6(%arg0: i32, %arg1: i32) -> (i32, i32) {
    %c0_i32 = arith.constant 0 : i32
    %c0_i32_0 = arith.constant 0 : i32
    %c0_i32_1 = arith.constant 0 : i32
    return %c0_i32, %c0_i32_0 : i32, i32
  }
  func.func @transform_7(%arg0: i32, %arg1: i32) -> (i32, i32) {
    %c0_i32 = arith.constant 0 : i32
    %c0_i32_0 = arith.constant 0 : i32
    %c0_i32_1 = arith.constant 0 : i32
    return %c0_i32, %c0_i32_0 : i32, i32
  }
  func.func @transform_8(%arg0: i32, %arg1: i32) -> (i32, i32) {
    %c0_i32 = arith.constant 0 : i32
    %c0_i32_0 = arith.constant 0 : i32
    %c0_i32_1 = arith.constant 0 : i32
    return %c0_i32, %c0_i32_0 : i32, i32
  }
  func.func @transform_9(%arg0: i32, %arg1: i32) -> (i32, i32) {
    %c0_i32 = arith.constant 0 : i32
    %c0_i32_0 = arith.constant 0 : i32
    %c0_i32_1 = arith.constant 0 : i32
    return %c0_i32, %c0_i32_0 : i32, i32
  }
  func.func @transform_10(%arg0: i32, %arg1: i32) -> (i32, i32) {
    %c0_i32 = arith.constant 0 : i32
    %c0_i32_0 = arith.constant 0 : i32
    %c0_i32_1 = arith.constant 0 : i32
    return %c0_i32, %c0_i32_0 : i32, i32
  }
  func.func @transform_11(%arg0: i32, %arg1: i32) -> (i32, i32) {
    %c0_i32 = arith.constant 0 : i32
    %c0_i32_0 = arith.constant 0 : i32
    %c0_i32_1 = arith.constant 0 : i32
    return %c0_i32, %c0_i32_0 : i32, i32
  }
  func.func @transform_12(%arg0: i32, %arg1: i32) -> (i32, i32) {
    %c0_i32 = arith.constant 0 : i32
    %c0_i32_0 = arith.constant 0 : i32
    %c0_i32_1 = arith.constant 0 : i32
    return %c0_i32, %c0_i32_0 : i32, i32
  }
  func.func @transform_13(%arg0: i32, %arg1: i32) -> (i32, i32, i32) {
    %c0_i32 = arith.constant 0 : i32
    %c0_i32_0 = arith.constant 0 : i32
    return %arg0, %arg1, %c0_i32 : i32, i32, i32
  }
}

module attributes {stable_mosaic.version = 11 : i64} {
  func.func @_backbone_kernel(%arg0: i32, %arg1: i32, %arg2: memref<1x16x128xf32, #tpu.memory_space<vmem>>, %arg3: memref<1x128x128xbf16, #tpu.memory_space<vmem>>, %arg4: memref<1x128x128xbf16, #tpu.memory_space<vmem>>, %arg5: memref<128x128xbf16, #tpu.memory_space<vmem>>, %arg6: memref<128x128xbf16, #tpu.memory_space<vmem>>, %arg7: memref<1x128xf32, #tpu.memory_space<vmem>>, %arg8: memref<1x128xf32, #tpu.memory_space<vmem>>, %arg9: memref<1x128xf32, #tpu.memory_space<vmem>>, %arg10: memref<1x128xf32, #tpu.memory_space<vmem>>, %arg11: memref<128x128xbf16, #tpu.memory_space<vmem>>, %arg12: memref<1x128xf32, #tpu.memory_space<vmem>>, %arg13: memref<128x128xbf16, #tpu.memory_space<vmem>>, %arg14: memref<1x128xf32, #tpu.memory_space<vmem>>, %arg15: memref<1x16x128xf32, #tpu.memory_space<vmem>>) attributes {dimension_semantics = [#tpu.dimension_semantics<parallel>, #tpu.dimension_semantics<parallel>], iteration_bounds = array<i64: 2, 1>, scalar_prefetch = 0 : i64, scratch_operands = 0 : i64, tpu.core_type = #tpu.core_type<tc>, window_params = [{transform_indices = @transform_0, window_bounds = array<i64: 1, 16, 128>}, {transform_indices = @transform_1, window_bounds = array<i64: 1, 128, 128>}, {transform_indices = @transform_2, window_bounds = array<i64: 1, 128, 128>}, {pipeline_mode = #tpu.pipeline_mode<synchronous>, transform_indices = @transform_3, window_bounds = array<i64: 128, 128>}, {pipeline_mode = #tpu.pipeline_mode<synchronous>, transform_indices = @transform_4, window_bounds = array<i64: 128, 128>}, {pipeline_mode = #tpu.pipeline_mode<synchronous>, transform_indices = @transform_5, window_bounds = array<i64: 1, 128>}, {pipeline_mode = #tpu.pipeline_mode<synchronous>, transform_indices = @transform_6, window_bounds = array<i64: 1, 128>}, {pipeline_mode = #tpu.pipeline_mode<synchronous>, transform_indices = @transform_7, window_bounds = array<i64: 1, 128>}, {pipeline_mode = #tpu.pipeline_mode<synchronous>, transform_indices = @transform_8, window_bounds = array<i64: 1, 128>}, {pipeline_mode = #tpu.pipeline_mode<synchronous>, transform_indices = @transform_9, window_bounds = array<i64: 128, 128>}, {pipeline_mode = #tpu.pipeline_mode<synchronous>, transform_indices = @transform_10, window_bounds = array<i64: 1, 128>}, {pipeline_mode = #tpu.pipeline_mode<synchronous>, transform_indices = @transform_11, window_bounds = array<i64: 128, 128>}, {pipeline_mode = #tpu.pipeline_mode<synchronous>, transform_indices = @transform_12, window_bounds = array<i64: 1, 128>}, {transform_indices = @transform_13, window_bounds = array<i64: 1, 16, 128>}]} {
    %c0 = arith.constant 0 : index
    %c0_0 = arith.constant 0 : index
    %c0_1 = arith.constant 0 : index
    %0 = vector.load %arg2[%c0, %c0_0, %c0_1] : memref<1x16x128xf32, #tpu.memory_space<vmem>>, vector<1x16x128xf32>
    %1 = vector.shape_cast %0 : vector<1x16x128xf32> to vector<16x128xf32>
    %c0_2 = arith.constant 0 : index
    %c0_3 = arith.constant 0 : index
    %c0_4 = arith.constant 0 : index
    %2 = vector.load %arg3[%c0_2, %c0_3, %c0_4] : memref<1x128x128xbf16, #tpu.memory_space<vmem>>, vector<1x128x128xbf16>
    %3 = vector.shape_cast %2 : vector<1x128x128xbf16> to vector<128x128xbf16>
    %c0_5 = arith.constant 0 : index
    %c0_6 = arith.constant 0 : index
    %c0_7 = arith.constant 0 : index
    %4 = vector.load %arg4[%c0_5, %c0_6, %c0_7] : memref<1x128x128xbf16, #tpu.memory_space<vmem>>, vector<1x128x128xbf16>
    %5 = vector.shape_cast %4 : vector<1x128x128xbf16> to vector<128x128xbf16>
    %6 = tpu.iota {dimensions = array<i32: 1>} : vector<1x128xi32>
    %c32_i32 = arith.constant 32 : i32
    %7 = vector.broadcast %c32_i32 : i32 to vector<1x128xi32>
    %8 = arith.cmpi slt, %6, %7 : vector<1x128xi32>
    %c0_8 = arith.constant 0 : index
    %c0_9 = arith.constant 0 : index
    %9 = vector.load %arg7[%c0_8, %c0_9] : memref<1x128xf32, #tpu.memory_space<vmem>>, vector<1x128xf32>
    %c0_10 = arith.constant 0 : index
    %c0_11 = arith.constant 0 : index
    %10 = vector.load %arg8[%c0_10, %c0_11] : memref<1x128xf32, #tpu.memory_space<vmem>>, vector<1x128xf32>
    %cst = arith.constant dense<0.000000e+00> : vector<16xf32>
    %11 = vector.multi_reduction <add>, %1, %cst [1] : vector<16x128xf32> to vector<16xf32>
    %12 = vector.shape_cast %11 : vector<16xf32> to vector<16x1xf32>
    %cst_12 = arith.constant 3.125000e-02 : f32
    %13 = vector.broadcast %cst_12 : f32 to vector<16x1xf32>
    %14 = arith.mulf %12, %13 : vector<16x1xf32>
    %15 = vector.broadcast %14 : vector<16x1xf32> to vector<16x128xf32>
    %16 = arith.subf %1, %15 : vector<16x128xf32>
    %cst_13 = arith.constant 0.000000e+00 : f32
    %17 = vector.shape_cast %8 : vector<1x128xi1> to vector<1x128xi1>
    %18 = vector.broadcast %17 : vector<1x128xi1> to vector<16x128xi1>
    %19 = vector.broadcast %cst_13 : f32 to vector<16x128xf32>
    %20 = arith.select %18, %16, %19 : vector<16x128xi1>, vector<16x128xf32>
    %21 = arith.mulf %20, %20 : vector<16x128xf32>
    %cst_14 = arith.constant dense<0.000000e+00> : vector<16xf32>
    %22 = vector.multi_reduction <add>, %21, %cst_14 [1] : vector<16x128xf32> to vector<16xf32>
    %23 = vector.shape_cast %22 : vector<16xf32> to vector<16x1xf32>
    %cst_15 = arith.constant 3.125000e-02 : f32
    %24 = vector.broadcast %cst_15 : f32 to vector<16x1xf32>
    %25 = arith.mulf %23, %24 : vector<16x1xf32>
    %cst_16 = arith.constant 9.99999974E-6 : f32
    %26 = vector.broadcast %cst_16 : f32 to vector<16x1xf32>
    %27 = arith.addf %25, %26 : vector<16x1xf32>
    %28 = math.rsqrt %27 : vector<16x1xf32>
    %29 = vector.broadcast %28 : vector<16x1xf32> to vector<16x128xf32>
    %30 = arith.mulf %20, %29 : vector<16x128xf32>
    %31 = vector.broadcast %9 : vector<1x128xf32> to vector<16x128xf32>
    %32 = arith.mulf %30, %31 : vector<16x128xf32>
    %33 = vector.broadcast %10 : vector<1x128xf32> to vector<16x128xf32>
    %34 = arith.addf %32, %33 : vector<16x128xf32>
    %35 = arith.truncf %34 : vector<16x128xf32> to vector<16x128xbf16>
    %c0_17 = arith.constant 0 : index
    %c0_18 = arith.constant 0 : index
    %36 = vector.load %arg5[%c0_17, %c0_18] : memref<128x128xbf16, #tpu.memory_space<vmem>>, vector<128x128xbf16>
    %cst_19 = arith.constant dense<0.000000e+00> : vector<16x128xf32>
    %37 = tpu.matmul %35, %36, %cst_19 {dimension_numbers = #tpu.dot_dimension_numbers<[1], [0], [0], [1], [0, 0, 1, 1], [], []>} : vector<16x128xbf16>, vector<128x128xbf16>, vector<16x128xf32> -> vector<16x128xf32>
    %cst_20 = arith.constant 0.176776692 : f32
    %38 = vector.broadcast %cst_20 : f32 to vector<16x128xf32>
    %39 = arith.mulf %37, %38 : vector<16x128xf32>
    %40 = arith.truncf %39 : vector<16x128xf32> to vector<16x128xbf16>
    %cst_21 = arith.constant dense<0.000000e+00> : vector<16x128xf32>
    %41 = tpu.matmul %40, %3, %cst_21 {dimension_numbers = #tpu.dot_dimension_numbers<[1], [0], [0], [1], [0, 0, 1, 1], [], []>} : vector<16x128xbf16>, vector<128x128xbf16>, vector<16x128xf32> -> vector<16x128xf32>
    %42 = tpu.iota {dimensions = array<i32: 1>} : vector<16x128xi32>
    %c8_i32 = arith.constant 8 : i32
    %43 = vector.broadcast %c8_i32 : i32 to vector<16x128xi32>
    %44 = arith.cmpi slt, %42, %43 : vector<16x128xi32>
    %cst_22 = arith.constant -1.000000e+30 : f32
    %45 = vector.broadcast %cst_22 : f32 to vector<16x128xf32>
    %46 = arith.select %44, %41, %45 : vector<16x128xi1>, vector<16x128xf32>
    %cst_23 = arith.constant dense<0xFF800000> : vector<16xf32>
    %47 = vector.multi_reduction <maximumf>, %46, %cst_23 [1] : vector<16x128xf32> to vector<16xf32>
    %48 = vector.shape_cast %47 : vector<16xf32> to vector<16x1xf32>
    %49 = vector.broadcast %48 : vector<16x1xf32> to vector<16x128xf32>
    %50 = arith.subf %46, %49 : vector<16x128xf32>
    %51 = math.exp %50 : vector<16x128xf32>
    %cst_24 = arith.constant dense<0.000000e+00> : vector<16xf32>
    %52 = vector.multi_reduction <add>, %51, %cst_24 [1] : vector<16x128xf32> to vector<16xf32>
    %53 = vector.shape_cast %52 : vector<16xf32> to vector<16x1xf32>
    %54 = arith.truncf %51 : vector<16x128xf32> to vector<16x128xbf16>
    %cst_25 = arith.constant dense<0.000000e+00> : vector<16x128xf32>
    %55 = tpu.matmul %54, %5, %cst_25 {dimension_numbers = #tpu.dot_dimension_numbers<[1], [0], [0], [1], [0, 0, 1, 1], [], []>} : vector<16x128xbf16>, vector<128x128xbf16>, vector<16x128xf32> -> vector<16x128xf32>
    %56 = tpu.reciprocal %53 {approx = true} : vector<16x1xf32> -> vector<16x1xf32>
    %57 = vector.broadcast %56 : vector<16x1xf32> to vector<16x128xf32>
    %58 = arith.mulf %55, %57 : vector<16x128xf32>
    %59 = arith.truncf %58 : vector<16x128xf32> to vector<16x128xbf16>
    %c0_26 = arith.constant 0 : index
    %c0_27 = arith.constant 0 : index
    %60 = vector.load %arg6[%c0_26, %c0_27] : memref<128x128xbf16, #tpu.memory_space<vmem>>, vector<128x128xbf16>
    %cst_28 = arith.constant dense<0.000000e+00> : vector<16x128xf32>
    %61 = tpu.matmul %59, %60, %cst_28 {dimension_numbers = #tpu.dot_dimension_numbers<[1], [0], [0], [1], [0, 0, 1, 1], [], []>} : vector<16x128xbf16>, vector<128x128xbf16>, vector<16x128xf32> -> vector<16x128xf32>
    %62 = arith.addf %1, %61 : vector<16x128xf32>
    %c0_29 = arith.constant 0 : index
    %c0_30 = arith.constant 0 : index
    %63 = vector.load %arg9[%c0_29, %c0_30] : memref<1x128xf32, #tpu.memory_space<vmem>>, vector<1x128xf32>
    %c0_31 = arith.constant 0 : index
    %c0_32 = arith.constant 0 : index
    %64 = vector.load %arg10[%c0_31, %c0_32] : memref<1x128xf32, #tpu.memory_space<vmem>>, vector<1x128xf32>
    %cst_33 = arith.constant dense<0.000000e+00> : vector<16xf32>
    %65 = vector.multi_reduction <add>, %62, %cst_33 [1] : vector<16x128xf32> to vector<16xf32>
    %66 = vector.shape_cast %65 : vector<16xf32> to vector<16x1xf32>
    %cst_34 = arith.constant 3.125000e-02 : f32
    %67 = vector.broadcast %cst_34 : f32 to vector<16x1xf32>
    %68 = arith.mulf %66, %67 : vector<16x1xf32>
    %69 = vector.broadcast %68 : vector<16x1xf32> to vector<16x128xf32>
    %70 = arith.subf %62, %69 : vector<16x128xf32>
    %cst_35 = arith.constant 0.000000e+00 : f32
    %71 = vector.shape_cast %8 : vector<1x128xi1> to vector<1x128xi1>
    %72 = vector.broadcast %71 : vector<1x128xi1> to vector<16x128xi1>
    %73 = vector.broadcast %cst_35 : f32 to vector<16x128xf32>
    %74 = arith.select %72, %70, %73 : vector<16x128xi1>, vector<16x128xf32>
    %75 = arith.mulf %74, %74 : vector<16x128xf32>
    %cst_36 = arith.constant dense<0.000000e+00> : vector<16xf32>
    %76 = vector.multi_reduction <add>, %75, %cst_36 [1] : vector<16x128xf32> to vector<16xf32>
    %77 = vector.shape_cast %76 : vector<16xf32> to vector<16x1xf32>
    %cst_37 = arith.constant 3.125000e-02 : f32
    %78 = vector.broadcast %cst_37 : f32 to vector<16x1xf32>
    %79 = arith.mulf %77, %78 : vector<16x1xf32>
    %cst_38 = arith.constant 9.99999974E-6 : f32
    %80 = vector.broadcast %cst_38 : f32 to vector<16x1xf32>
    %81 = arith.addf %79, %80 : vector<16x1xf32>
    %82 = math.rsqrt %81 : vector<16x1xf32>
    %83 = vector.broadcast %82 : vector<16x1xf32> to vector<16x128xf32>
    %84 = arith.mulf %74, %83 : vector<16x128xf32>
    %85 = vector.broadcast %63 : vector<1x128xf32> to vector<16x128xf32>
    %86 = arith.mulf %84, %85 : vector<16x128xf32>
    %87 = vector.broadcast %64 : vector<1x128xf32> to vector<16x128xf32>
    %88 = arith.addf %86, %87 : vector<16x128xf32>
    %89 = arith.truncf %88 : vector<16x128xf32> to vector<16x128xbf16>
    %c0_39 = arith.constant 0 : index
    %c0_40 = arith.constant 0 : index
    %90 = vector.load %arg11[%c0_39, %c0_40] : memref<128x128xbf16, #tpu.memory_space<vmem>>, vector<128x128xbf16>
    %cst_41 = arith.constant dense<0.000000e+00> : vector<16x128xf32>
    %91 = tpu.matmul %89, %90, %cst_41 {dimension_numbers = #tpu.dot_dimension_numbers<[1], [0], [0], [1], [0, 0, 1, 1], [], []>} : vector<16x128xbf16>, vector<128x128xbf16>, vector<16x128xf32> -> vector<16x128xf32>
    %c0_42 = arith.constant 0 : index
    %c0_43 = arith.constant 0 : index
    %92 = vector.load %arg12[%c0_42, %c0_43] : memref<1x128xf32, #tpu.memory_space<vmem>>, vector<1x128xf32>
    %93 = vector.broadcast %92 : vector<1x128xf32> to vector<16x128xf32>
    %94 = arith.addf %91, %93 : vector<16x128xf32>
    %95 = arith.mulf %94, %94 : vector<16x128xf32>
    %96 = arith.mulf %94, %95 : vector<16x128xf32>
    %cst_44 = arith.constant 4.471500e-02 : f32
    %97 = vector.broadcast %cst_44 : f32 to vector<16x128xf32>
    %98 = arith.mulf %97, %96 : vector<16x128xf32>
    %99 = arith.addf %94, %98 : vector<16x128xf32>
    %cst_45 = arith.constant 0.797884583 : f32
    %100 = vector.broadcast %cst_45 : f32 to vector<16x128xf32>
    %101 = arith.mulf %100, %99 : vector<16x128xf32>
    %102 = math.tanh %101 : vector<16x128xf32>
    %cst_46 = arith.constant 1.000000e+00 : f32
    %103 = vector.broadcast %cst_46 : f32 to vector<16x128xf32>
    %104 = arith.addf %103, %102 : vector<16x128xf32>
    %cst_47 = arith.constant 5.000000e-01 : f32
    %105 = vector.broadcast %cst_47 : f32 to vector<16x128xf32>
    %106 = arith.mulf %105, %104 : vector<16x128xf32>
    %107 = arith.mulf %94, %106 : vector<16x128xf32>
    %108 = arith.truncf %107 : vector<16x128xf32> to vector<16x128xbf16>
    %c0_48 = arith.constant 0 : index
    %c0_49 = arith.constant 0 : index
    %109 = vector.load %arg13[%c0_48, %c0_49] : memref<128x128xbf16, #tpu.memory_space<vmem>>, vector<128x128xbf16>
    %cst_50 = arith.constant dense<0.000000e+00> : vector<16x128xf32>
    %110 = tpu.matmul %108, %109, %cst_50 {dimension_numbers = #tpu.dot_dimension_numbers<[1], [0], [0], [1], [0, 0, 1, 1], [], []>} : vector<16x128xbf16>, vector<128x128xbf16>, vector<16x128xf32> -> vector<16x128xf32>
    %111 = arith.addf %62, %110 : vector<16x128xf32>
    %c0_51 = arith.constant 0 : index
    %c0_52 = arith.constant 0 : index
    %112 = vector.load %arg14[%c0_51, %c0_52] : memref<1x128xf32, #tpu.memory_space<vmem>>, vector<1x128xf32>
    %113 = vector.broadcast %112 : vector<1x128xf32> to vector<16x128xf32>
    %114 = arith.addf %111, %113 : vector<16x128xf32>
    %c0_53 = arith.constant 0 : index
    %c0_54 = arith.constant 0 : index
    %c0_55 = arith.constant 0 : index
    %115 = vector.load %arg15[%c0_53, %c0_54, %c0_55] : memref<1x16x128xf32, #tpu.memory_space<vmem>>, vector<1x16x128xf32>
    %116 = vector.shape_cast %115 : vector<1x16x128xf32> to vector<16x128xf32>
    %117 = vector.shape_cast %114 : vector<16x128xf32> to vector<1x16x128xf32>
    tpu.vector_store %arg15[%c0_53, %c0_54, %c0_55], %117 {strides = array<i32>} : memref<1x16x128xf32, #tpu.memory_space<vmem>>, vector<1x16x128xf32>,
    return
  }
  func.func @transform_0(%arg0: i32, %arg1: i32) -> (i32, i32, i32) {
    %c0_i32 = arith.constant 0 : i32
    %c0_i32_0 = arith.constant 0 : i32
    return %arg0, %arg1, %c0_i32 : i32, i32, i32
  }
  func.func @transform_1(%arg0: i32, %arg1: i32) -> (i32, i32, i32) {
    %c0_i32 = arith.constant 0 : i32
    %c0_i32_0 = arith.constant 0 : i32
    %c0_i32_1 = arith.constant 0 : i32
    return %arg0, %c0_i32, %c0_i32_0 : i32, i32, i32
  }
  func.func @transform_2(%arg0: i32, %arg1: i32) -> (i32, i32, i32) {
    %c0_i32 = arith.constant 0 : i32
    %c0_i32_0 = arith.constant 0 : i32
    %c0_i32_1 = arith.constant 0 : i32
    return %arg0, %c0_i32, %c0_i32_0 : i32, i32, i32
  }
  func.func @transform_3(%arg0: i32, %arg1: i32) -> (i32, i32) {
    %c0_i32 = arith.constant 0 : i32
    %c0_i32_0 = arith.constant 0 : i32
    %c0_i32_1 = arith.constant 0 : i32
    return %c0_i32, %c0_i32_0 : i32, i32
  }
  func.func @transform_4(%arg0: i32, %arg1: i32) -> (i32, i32) {
    %c0_i32 = arith.constant 0 : i32
    %c0_i32_0 = arith.constant 0 : i32
    %c0_i32_1 = arith.constant 0 : i32
    return %c0_i32, %c0_i32_0 : i32, i32
  }
  func.func @transform_5(%arg0: i32, %arg1: i32) -> (i32, i32) {
    %c0_i32 = arith.constant 0 : i32
    %c0_i32_0 = arith.constant 0 : i32
    %c0_i32_1 = arith.constant 0 : i32
    return %c0_i32, %c0_i32_0 : i32, i32
  }
  func.func @transform_6(%arg0: i32, %arg1: i32) -> (i32, i32) {
    %c0_i32 = arith.constant 0 : i32
    %c0_i32_0 = arith.constant 0 : i32
    %c0_i32_1 = arith.constant 0 : i32
    return %c0_i32, %c0_i32_0 : i32, i32
  }
  func.func @transform_7(%arg0: i32, %arg1: i32) -> (i32, i32) {
    %c0_i32 = arith.constant 0 : i32
    %c0_i32_0 = arith.constant 0 : i32
    %c0_i32_1 = arith.constant 0 : i32
    return %c0_i32, %c0_i32_0 : i32, i32
  }
  func.func @transform_8(%arg0: i32, %arg1: i32) -> (i32, i32) {
    %c0_i32 = arith.constant 0 : i32
    %c0_i32_0 = arith.constant 0 : i32
    %c0_i32_1 = arith.constant 0 : i32
    return %c0_i32, %c0_i32_0 : i32, i32
  }
  func.func @transform_9(%arg0: i32, %arg1: i32) -> (i32, i32) {
    %c0_i32 = arith.constant 0 : i32
    %c0_i32_0 = arith.constant 0 : i32
    %c0_i32_1 = arith.constant 0 : i32
    return %c0_i32, %c0_i32_0 : i32, i32
  }
  func.func @transform_10(%arg0: i32, %arg1: i32) -> (i32, i32) {
    %c0_i32 = arith.constant 0 : i32
    %c0_i32_0 = arith.constant 0 : i32
    %c0_i32_1 = arith.constant 0 : i32
    return %c0_i32, %c0_i32_0 : i32, i32
  }
  func.func @transform_11(%arg0: i32, %arg1: i32) -> (i32, i32) {
    %c0_i32 = arith.constant 0 : i32
    %c0_i32_0 = arith.constant 0 : i32
    %c0_i32_1 = arith.constant 0 : i32
    return %c0_i32, %c0_i32_0 : i32, i32
  }
  func.func @transform_12(%arg0: i32, %arg1: i32) -> (i32, i32) {
    %c0_i32 = arith.constant 0 : i32
    %c0_i32_0 = arith.constant 0 : i32
    %c0_i32_1 = arith.constant 0 : i32
    return %c0_i32, %c0_i32_0 : i32, i32
  }
  func.func @transform_13(%arg0: i32, %arg1: i32) -> (i32, i32, i32) {
    %c0_i32 = arith.constant 0 : i32
    %c0_i32_0 = arith.constant 0 : i32
    return %arg0, %arg1, %c0_i32 : i32, i32, i32
  }
}

</mosaic_0001>

<bundles_post_ra>
// kernel: tpu_custom_call.1
= control target key start
LH: loop header
LB: loop body
LE: loop exit
PB: predicated region body
PF: predicated region fallthrough
CT: control target
= control target key end

     0   :  { %s2767_s0 = inlined_call_operand.hbm [shape: f32[2,16,128], index: 0, kind: input, shape index: {}]   ;;  %s2768_s1 = inlined_call_operand.hbm [shape: bf16[2,128,128], index: 1, kind: input, shape index: {}]   ;;  %s2769_s2 = inlined_call_operand.hbm [shape: bf16[2,128,128], index: 2, kind: input, shape index: {}]   ;;  %s2770_s3 = inlined_call_operand.hbm [shape: bf16[128,128], index: 3, kind: input, shape index: {}]   ;;  %s2771_s4 = inlined_call_operand.hbm [shape: bf16[128,128], index: 4, kind: input, shape index: {}]   ;;  %s2772_s5 = inlined_call_operand.vmem [shape: f32[1,128], index: 5, kind: input, shape index: {}]   ;;  %s2773_s6 = inlined_call_operand.vmem [shape: f32[1,128], index: 6, kind: input, shape index: {}]   ;;  %s2774_s7 = inlined_call_operand.vmem [shape: f32[1,128], index: 7, kind: input, shape index: {}]   ;;  %s2775_s8 = inlined_call_operand.vmem [shape: f32[1,128], index: 8, kind: input, shape index: {}]   ;;  %s2776_s9 = inlined_call_operand.hbm [shape: bf16[128,128], index: 9, kind: input, shape index: {}]   ;;  %s2777_s10 = inlined_call_operand.vmem [shape: f32[1,128], index: 10, kind: input, shape index: {}]   ;;  %s2778_s11 = inlined_call_operand.hbm [shape: bf16[128,128], index: 11, kind: input, shape index: {}]   ;;  %s2779_s12 = inlined_call_operand.vmem [shape: f32[1,128], index: 12, kind: input, shape index: {}]   ;;  %s2780_s13 = inlined_call_operand.hbm [shape: f32[2,16,128], index: 13, kind: output, shape index: {}]  }
   0x1   :  { %2795 = sst [smem:[#allocation23_spill]] %s2768_s1 }
   0x2   :  { %2796 = sst [smem:[#allocation24_spill]] %s2770_s3 }
   0x3   :  { %2797 = sst [smem:[#allocation25_spill]] %s2775_s8 }
   0x4   :  { %2798 = sst [smem:[#allocation26_spill]] %s2777_s10 }
   0x5   :  { %2799 = sst [smem:[#allocation27_spill]] %s2779_s12 }
   0x6   :  { %2800 = sst [smem:[#allocation28_spill]] %s2780_s13 }
   0x7   :  { %18 = vsyncpa [#allocation3], 0 }
   0x8   :  { %20 = vsyncpa [#allocation3 + $0x1], 0 }
   0x9   :  { %21 = vsyncpa [#allocation6], 0 }
   0xa   :  { %22 = vsyncpa [#allocation9], 0 }
   0xb   :  { %23 = vsyncpa [#allocation12], 0 }
   0xc   :  { %24 = vsyncpa [#allocation4], 0 }
   0xd   :  { %26 = vsyncpa [#allocation4 + $0x1], 0  ;;  %s2355_s25 = smov 0   ;;  %s2357_s26 = smov 0  }
   0xe   :  { %s2359_s27 = smov 0   ;;  %s2361_s28 = smov 0  }
   0xf   :  { %s2363_s29 = smov 0   ;;  %s2365_s30 = smov 0  }
  0x10 LB: > { %2801 = sst [smem:[#allocation20_spill]] %s2247_s25  ;;  %s1537_s14 = sadd.s32 4294967295, %s2267_s30   ;;  %s2267_s30 = sphi %s2365_s30, %s32_s30   ;;  %s2263_s29 = sphi %s2363_s29, %s2839_s29   ;;  %s2259_s28 = sphi %s2361_s28, %s2838_s28   ;;  %s2255_s27 = sphi %s2359_s27, %s2837_s27   ;;  %s2251_s26 = sphi %s2357_s26, %s2836_s26   ;;  %s2247_s25 = sphi %s2355_s25, %s2835_s25  }
  0x11   : > { %2802 = sst [smem:[#allocation21_spill]] %s2259_s28  ;;  %s1538_s15 = sadd.s32 4294967294, %s2267_s30  }
  0x12   : > { %p66_p0 = scmp.ne.s32.totalorder %s2251_s26, %s2247_s25  ;;  %p2389_p1 = scmp.eq.s32.totalorder %s1537_s14, 0 }
  0x13   : > { %p2393_p2 = scmp.eq.s32.totalorder %s1537_s14, 1  ;;  %p360_p3 = scmp.eq.s32.totalorder %s1538_s15, 1 }
  0x14   : > { %s2803_s16 = scalar_select %p2389_p1, 1, 0 }
  0x15   : > { %s2804_s17 = scalar_select %p2393_p2, 1, 0 }
  0x16   : > { %p2399_p4 = por %p2389_p1, %p66_p0  ;;  %p1539_p5 = scmp.ge.s32.totalorder %s2267_s30, 1 }
  0x17   : > { %p2404_p6 = por %p360_p3, %p66_p0  ;;  %p367_p7 = scmp.lt.s32.totalorder %s2267_s30, 3 }
  0x18   : > { %s2805_s18 = scalar_select %p2399_p4, 1, 0 }
  0x19   : > { %s2806_s19 = scalar_select %p2404_p6, 1, 0 }
  0x1a   : > { %s1618_s20 = sshll.u32 %s2259_s28, 10  ;;  %p2410_p8 = pnand %p1539_p5, %p367_p7 }
  0x1b   : > { %2807 = sst [smem:[#allocation22_spill]] %s2806_s19  ;;  %s2269_s14 = smov [#allocation5]  }
  0x1c   : > { %s2808_s21 = scalar_select %p2410_p8, 1, 0 }
  0x1d   : > { %s2809_s1 = sld [smem:[#allocation23_spill]]  ;;  %s382_s15 = sshll.u32 %s2269_s14, 4  ;;  %s2421_s15 = int_to_ptr.vmem [resolvable:$true] %s382_s15 }
  0x1e   : > { %p2785_p9 = pneg %p2410_p8  ;;  %s2426_s13 = scalar_lea.hbm %s2769_s2, %s1618_s20 }
  0x1f   : > { %s2270_s23 = smov [#allocation8]  }
  0x20   : > { %p2433_p10 = pnand %p2785_p9, %p2399_p4  ;;  %s411_s14 = sshll.u32 %s2270_s23, 4  ;;  %s412_s14 = int_to_ptr.vmem [resolvable:$true] %s411_s14 }
  0x22   : > { %p1989_p13 = pneg %p2433_p10 }
  0x23   : > { %s2417_s24 = scalar_lea.hbm %s2809_s1, %s1618_s20  ;;  %s1992_s20 = scalar_lea.hbm %s2809_s1, 2048 }
  0x24   : > { %s1987_s12 = scalar_lea.hbm %s2417_s24, 1024  ;;  %p1993_p5 = scmp.lt.s32.totalorder %s2417_s24, %s2809_s1 }
  0x25   : > { %p1988_p12 = scmp.ne.s32.totalorder %s2417_s24, %s1987_s12  ;;  %p1994_p7 = scmp.lt.s32.totalorder %s1992_s20, %s1987_s12 }
  0x27   : > { %p1990_p0 = pnand %p1989_p13, %p1988_p12  ;;  %p1995_p11 = por %p1994_p7, %p1993_p5 }
  0x29   : > { %p1991_p3 = pneg %p1990_p0 }
  0x2b   : > { %p1996_p9 = pnand %p1995_p11, %p1991_p3 }
  0x2d   : > { %1999 = shalt.err (!%p1996_p9)
}
  0x2e   : > { %s2000_s23 = scalar_lea.vmem %s2421_s15, 1024  ;;  %p2008_p4 = scmp.lt.s32.totalorder %s2421_s15, %s2421_s15 }
  0x2f   : > { %p2001_p6 = scmp.ne.s32.totalorder %s2421_s15, %s2000_s23  ;;  %p2009_p2 = scmp.lt.s32.totalorder %s2000_s23, %s2000_s23 }
  0x31   : > { %p2003_p12 = pnand %p2001_p6, %p1989_p13  ;;  %p2010_p8 = por %p2009_p2, %p2008_p4 }
  0x33   : > { %p2004_p0 = pneg %p2003_p12 }
  0x35   : > { %p2011_p1 = pnand %p2010_p8, %p2004_p0 }
  0x37   : > { %2014 = shalt.err (!%p2011_p1)
}
  0x38   : > { %s2271_s10 = smov 64   ;;  %s2272_s12 = smov 4  }
  0x39   : > { %1823 = dma.hbm_to_vmem [thread:$0]  (!%p2433_p10), %s2417_s24, 1024, %s2421_s15, [#allocation6], %s2271_s10, %s2271_s10, %s2272_s12  }
  0x3a   : > { %p2811_p6 = scmp.ne.s32.totalorder %s2803_s16, 0  ;;  %p2812_p9 = scmp.ne.s32.totalorder %s2808_s21, 0 }
  0x3b   : > { %s2273_s25 = smov [#allocation11]   ;;  %s2026_s20 = scalar_lea.vmem %s412_s14, 1024 }
  0x3c   : > { %p2813_p11 = pneg %p2812_p9  ;;  %s449_s19 = sshll.u32 %s2273_s25, 4  ;;  %s450_s19 = int_to_ptr.vmem [resolvable:$true] %s449_s19 }
  0x3d   : > { %p2027_p2 = scmp.ne.s32.totalorder %s412_s14, %s2026_s20  ;;  %p2034_p5 = scmp.lt.s32.totalorder %s412_s14, %s412_s14 }
  0x3e   : > { %p2471_p3 = pnand %p2813_p11, %p2811_p6  ;;  %p2035_p7 = scmp.lt.s32.totalorder %s2026_s20, %s2026_s20 }
  0x40   : > { %s2814_s28 = scalar_select %p2471_p3, 1, 0 }
  0x41   : > { %p2792_p1 = pneg %p2471_p3  ;;  %p2036_p12 = por %p2035_p7, %p2034_p5 }
  0x43   : > { %p2029_p4 = pnand %p2027_p2, %p2792_p1 }
  0x45   : > { %p2030_p8 = pneg %p2029_p4 }
  0x47   : > { %p2037_p0 = pnand %p2036_p12, %p2030_p8 }
  0x49   : > { %2040 = shalt.err (!%p2037_p0)
}
  0x4a   : > { %s2815_s3 = sld [smem:[#allocation24_spill]]  ;;  %s2274_s23 = smov [#allocation7]  }
  0x4b   : > { %s398_s25 = sshll.u32 %s2274_s23, 4  ;;  %s2052_s1 = scalar_lea.vmem %s450_s19, 1024  ;;  %s399_s25 = int_to_ptr.vmem [resolvable:$true] %s398_s25 }
  0x4c   : > { %p2053_p6 = scmp.ne.s32.totalorder %s450_s19, %s2052_s1  ;;  %p2060_p4 = scmp.lt.s32.totalorder %s450_s19, %s450_s19 }
  0x4d   : > { %p2061_p8 = scmp.lt.s32.totalorder %s2052_s1, %s2052_s1 }
  0x4e   : > { %p2055_p11 = pnand %p2053_p6, %p2792_p1 }
  0x4f   : > { %p2062_p5 = por %p2061_p8, %p2060_p4 }
  0x50   : > { %1829 = dma.hbm_to_vmem [thread:$0]  (!%p2471_p3), %s2815_s3, 1024, %s412_s14, [#allocation9], %s2271_s10, %s2271_s10, %s2272_s12  }
  0x51   : > { %p2056_p2 = pneg %p2055_p11 }
  0x53   : > { %p2063_p7 = pnand %p2062_p5, %p2056_p2 }
  0x55   : > { %2066 = shalt.err (!%p2063_p7)
}
  0x56   : > { %1835 = dma.hbm_to_vmem [thread:$0]  (!%p2471_p3), %s2776_s9, 1024, %s450_s19, [#allocation12], %s2271_s10, %s2271_s10, %s2272_s12  }
  0x57   : > { %s2067_s24 = scalar_lea.hbm %s2426_s13, 1024  ;;  %s2072_s23 = scalar_lea.hbm %s2769_s2, 2048 }
  0x58   : > { %p2068_p12 = scmp.ne.s32.totalorder %s2426_s13, %s2067_s24  ;;  %p2073_p11 = scmp.lt.s32.totalorder %s2426_s13, %s2769_s2 }
  0x59   : > { %p2074_p2 = scmp.lt.s32.totalorder %s2072_s23, %s2067_s24 }
  0x5a   : > { %p2070_p0 = pnand %p2068_p12, %p1989_p13 }
  0x5b   : > { %p2075_p4 = por %p2074_p2, %p2073_p11 }
  0x5c   : > { %p2071_p6 = pneg %p2070_p0 }
  0x5e   : > { %p2076_p8 = pnand %p2075_p4, %p2071_p6 }
  0x60   : > { %2079 = shalt.err (!%p2076_p8)
}
  0x61   : > { %s2080_s19 = scalar_lea.vmem %s399_s25, 1024  ;;  %p2088_p0 = scmp.lt.s32.totalorder %s399_s25, %s399_s25 }
  0x62   : > { %p2081_p5 = scmp.ne.s32.totalorder %s399_s25, %s2080_s19  ;;  %p2089_p1 = scmp.lt.s32.totalorder %s2080_s19, %s2080_s19 }
  0x64   : > { %p2083_p7 = pnand %p2081_p5, %p1989_p13  ;;  %p2090_p9 = por %p2089_p1, %p2088_p0 }
  0x66   : > { %p2084_p12 = pneg %p2083_p7 }
  0x68   : > { %p2091_p3 = pnand %p2090_p9, %p2084_p12 }
  0x6a   : > { %2094 = shalt.err (!%p2091_p3)
}
  0x6b   : > { %1826 = dma.hbm_to_vmem [thread:$0]  (!%p2433_p10), %s2426_s13, 1024, %s399_s25, [#allocation6], %s2271_s10, %s2271_s10, %s2272_s12  }
  0x6c   : > { %s2275_s3 = smov [#allocation10]   ;;  %s2276_s14 = smov [#allocation13]  }
  0x6d   : > { %s424_s8 = sshll.u32 %s2275_s3, 4  ;;  %s465_s20 = sshll.u32 %s2276_s14, 4  ;;  %s425_s8 = int_to_ptr.vmem [resolvable:$true] %s424_s8  ;;  %s466_s20 = int_to_ptr.vmem [resolvable:$true] %s465_s20 }
  0x6e   : > { %s2106_s24 = scalar_lea.vmem %s425_s8, 1024  ;;  %p2816_p6 = scmp.ne.s32.totalorder %s2814_s28, 0 }
  0x6f   : > { %p2107_p13 = scmp.ne.s32.totalorder %s425_s8, %s2106_s24  ;;  %p2114_p3 = scmp.lt.s32.totalorder %s425_s8, %s425_s8 }
  0x70   : > { %p2817_p11 = pneg %p2816_p6  ;;  %p2115_p2 = scmp.lt.s32.totalorder %s2106_s24, %s2106_s24 }
  0x72   : > { %p2109_p1 = pnand %p2107_p13, %p2817_p11  ;;  %p2116_p4 = por %p2115_p2, %p2114_p3 }
  0x74   : > { %p2110_p9 = pneg %p2109_p1 }
  0x76   : > { %p2117_p8 = pnand %p2116_p4, %p2110_p9 }
  0x78   : > { %2120 = shalt.err (!%p2117_p8)
}
  0x79   : > { %1832 = dma.hbm_to_vmem [thread:$0]  (!%p2816_p6), %s2771_s4, 1024, %s425_s8, [#allocation9], %s2271_s10, %s2271_s10, %s2272_s12  }
  0x7a   : > { %s2132_s25 = scalar_lea.vmem %s466_s20, 1024  ;;  %p2818_p5 = pmov %p2817_p11 }
  0x7b   : > { %p2133_p10 = scmp.ne.s32.totalorder %s466_s20, %s2132_s25  ;;  %p2140_p0 = scmp.lt.s32.totalorder %s466_s20, %s466_s20 }
  0x7c   : > { %p2141_p13 = scmp.lt.s32.totalorder %s2132_s25, %s2132_s25 }
  0x7d   : > { %p2135_p7 = pnand %p2133_p10, %p2818_p5 }
  0x7e   : > { %p2142_p11 = por %p2141_p13, %p2140_p0 }
  0x7f   : > { %p2136_p12 = pneg %p2135_p7 }
  0x81   : > { %p2143_p1 = pnand %p2142_p11, %p2136_p12 }
  0x83   : > { %2146 = shalt.err (!%p2143_p1)
}
  0x84   : > { %1838 = dma.hbm_to_vmem [thread:$0]  (!%p2816_p6), %s2778_s11, 1024, %s466_s20, [#allocation12], %s2271_s10, %s2271_s10, %s2272_s12  }
  0x85   : > { %s53_s23 = sadd.s32 1, %s2255_s27  ;;  %s44_s28 = sadd.s32 1, %s2263_s29 }
  0x86   : > { %p60_p9 = scmp.ne.s32.totalorder %s2255_s27, %s2251_s26  ;;  %p46_p3 = scmp.ge.s32.totalorder %s44_s28, 2 }
  0x87   : > { %p61_p2 = scmp.eq.s32.totalorder %s2267_s30, 0  ;;  %p2819_p4 = scmp.ne.s32.totalorder %s2804_s17, 0 }
  0x88   : > { %p1851_p10 = scmp.lt.s32.totalorder %s2267_s30, 2  ;;  %s2841_s28 = smov (%p46_p3, %s44_s28), 0 }
  0x89   : > { %p2549_p8 = por %p2819_p4, %p60_p9  ;;  %p62_p5 = por %p61_p2, %p60_p9 }
  0x8a   : > { %s482_s3 = sand.u32 1, %s2255_s27   ;;  %s48_s8 = ssub.s32 %s2263_s29, %s2841_s28 }
  0x8b   : > { %p51_p7 = scmp.eq.s32.totalorder %s48_s8, 0  ;;  %s1549_s10 = sshll.u32 %s482_s3, 4 }
  0x8c   : > { %s1620_s12 = sshll.u32 %s2263_s29, 8  ;;  %s486_s13 = scalar_lea.vmem [#allocation2], %s1549_s10 }
  0x8d   : > { %s2561_s14 = scalar_select %p51_p7, %s2255_s27, %s53_s23  }
  0x8e   : > { %s494_s17 = scalar_lea.hbm %s2767_s0, %s1620_s12  ;;  %s495_s22 = sshll.u32 %s486_s13, 4  ;;  %s496_s22 = int_to_ptr.vmem [resolvable:$true] %s495_s22 }
  0x8f   : > { %p2568_p6 = pnand %p1851_p10, %p62_p5  ;;  %s483_s1 = scalar_lea.sflag [#allocation3], %s482_s3 }
  0x90   : > { %s2160_s15 = scalar_lea.vmem %s496_s22, 256  ;;  %s2277_s23 = smov [#allocation2]  }
  0x91   : > { %p2149_p12 = pneg %p2568_p6  ;;  %p2161_p0 = scmp.ne.s32.totalorder %s496_s22, %s2160_s15 }
  0x92   : > { %s2165_s8 = sshll.u32 %s2277_s23, 4  ;;  %s2166_s8 = int_to_ptr.vmem [resolvable:$false] %s2165_s8 }
  0x93   : > { %p2163_p13 = pnand %p2161_p0, %p2149_p12  ;;  %s2167_s12 = scalar_lea.vmem %s2166_s8, 512 }
  0x94   : > { %p2168_p1 = scmp.lt.s32.totalorder %s496_s22, %s2166_s8  ;;  %p2169_p9 = scmp.lt.s32.totalorder %s2167_s12, %s2160_s15 }
  0x95   : > { %p2164_p11 = pneg %p2163_p13 }
  0x96   : > { %p2170_p3 = por %p2169_p9, %p2168_p1 }
  0x98   : > { %p2171_p2 = pnand %p2170_p3, %p2164_p11 }
  0x9a   : > { %2174 = shalt.err (!%p2171_p2)
}
  0x9b   : > { %s2278_s10 = smov 128   ;;  %s2279_s20 = smov 8  }
  0x9c   : > { %1842 = dma.hbm_to_vmem [thread:$0]  (!%p2568_p6), %s494_s17, 256, %s496_s22, %s483_s1, %s2278_s10, %s2278_s10, %s2279_s20  }
  0x9d   : > { %p2822_p4 = scmp.ne.s32.totalorder %s2808_s21, 0 }
  0x9e   : > { %s2579_s3 = sand.u32 (!%p2822_p4), 1, %s2251_s26   ;;  %p2823_p10 = scmp.ne.s32.totalorder (!%p2822_p4), %s2805_s18, 0 }
  0x9f   : > { %507 = sbr.rel (%p2822_p4) target bundleno = 2198 (0x896), region = 72  ;;  %s1553_s24 = sshll.u32 (!%p2822_p4), %s2579_s3, 4 }
  0xa0   : > { %s510_s13 = scalar_lea.sflag (!%p2822_p4), [#allocation3], %s2579_s3  ;;  %s513_s15 = scalar_lea.vmem (!%p2822_p4), [#allocation2], %s1553_s24 }
  0xa4   : > { %2226 = dma.done.wait (%p2823_p10), %s510_s13, 256  }
  0xa5   : > { %2228 = vsyncadd (%p2823_p10), %s510_s13, 4294967040 }
  0xa6   : > { %2230 = dma.done.wait (%p2823_p10), [#allocation6], 2048  }
  0xa7   : > { %2232 = vsyncadd (%p2823_p10), [#allocation6], 4294965248  ;;  %p2824_p5 = scmp.ne.s32.totalorder %s2803_s16, 0 }
  0xa9   : > { %2234 = dma.done.wait (%p2824_p5), [#allocation9], 2048  }
  0xaa   : > { %2236 = vsyncadd (%p2824_p5), [#allocation9], 4294965248 }
  0xab   : > { %2238 = dma.done.wait (%p2824_p5), [#allocation12], 2048  }
  0xac   : > { %2240 = vsyncadd (%p2824_p5), [#allocation12], 4294965248  ;;  %v2601_v0 = vld [vmem:[%s513_s15] sm:$0xff]  ;;  %v2603_v1 = vld [vmem:[%s513_s15 + $0x8] sm:$0xff]  ;;  %v2280_v3 = vmov 0.0   ;;  %v617_v4 = vlaneseq  ;;  %vm2281_vm1 = vmmov 0  }
  0xad   : > { %622 = vadd.xlane.f32.xlu0 %v2601_v0  ;;  %v1919_v2 = vld [vmem:[#allocation8 + $0x38] sm:$0xff]   ;;  %1676 = vmatprep.subr.bf16.mxu0 %v2280_v3  ;;  %v1920_v16 = vld [vmem:[#allocation8 + $0x30] sm:$0xff]   ;;  %v1921_v17 = vld [vmem:[#allocation8 + $0x28] sm:$0xff]   ;;  %s2825_s8 = sld [smem:[#allocation25_spill]]  ;;  %s579_s21 = scalar_lea.vmem [#allocation14], %s1553_s24 }
  0xae   : > { %1696 = vmatprep.subr.bf16.mxu1 %v2280_v3  ;;  %1677 = vmatpush3.bf16.msra.mxu0 %v1919_v2  ;;  %v2610_v5 = vand.u32 127, %v617_v4  ;;  %v1922_v18 = vld [vmem:[#allocation8 + $0x20] sm:$0xff]   ;;  %v1923_v19 = vld [vmem:[#allocation8 + $0x18] sm:$0xff]   ;;  %v1924_v20 = vld [vmem:[#allocation8 + $0x10] sm:$0xff]   ;;  %s2826_s20 = sld [smem:[#allocation26_spill]]  ;;  %s1389_s17 = sshll.u32 %s579_s21, 4  ;;  %s2713_s17 = int_to_ptr.vmem [resolvable:$true] %s1389_s17 }
  0xaf   : > { %1678 = vmatprep.subr.bf16.mxu0 %v2280_v3  ;;  %1692 = vmatprep.mubr.msk.bf16.mxu0 %vm2281_vm1, %v2280_v3  ;;  %v1925_v21 = vld [vmem:[#allocation8 + $0x8] sm:$0xff]   ;;  %v1926_v22 = vld [vmem:[#allocation8] sm:$0xff]   ;;  %v1927_v23 = vld [vmem:[#allocation5 + $0x38] sm:$0xff]   ;;  %s2827_s13 = sld [smem:[#allocation21_spill]]  ;;  %s1374_s24 = scalar_lea.sflag [#allocation4], %s2579_s3 }
  0xb0   : > { %vm619_vm0 = vcmp.lt.s32.totalorder %v2610_v5, 32  ;;  %1712 = vmatprep.mubr.msk.bf16.mxu1 %vm2281_vm1, %v2280_v3  ;;  %1697 = vmatpush3.bf16.msra.mxu1 %v1927_v23  ;;  %v1928_v24 = vld [vmem:[#allocation5 + $0x30] sm:$0xff]   ;;  %v1929_v25 = vld [vmem:[#allocation5 + $0x28] sm:$0xff]   ;;  %v1930_v26 = vld [vmem:[#allocation5 + $0x20] sm:$0xff]   ;;  %vm862_vm2 = vcmp.lt.s32.totalorder %v2610_v5, 8  ;;  %s2828_s18 = sld [smem:[#allocation27_spill]] }
  0xb1   : > { %624 = vadd.xlane.f32.xlu0 %v2603_v1  ;;  %1698 = vmatprep.subr.bf16.mxu1 %v2280_v3  ;;  %v1931_v27 = vld [vmem:[#allocation5 + $0x18] sm:$0xff]   ;;  %v1932_v28 = vld [vmem:[#allocation5 + $0x10] sm:$0xff]   ;;  %v1559_v37 = vld [vmem:[%s2772_s5] ss:$0 sm:$0xff]  ;;  %s2829_s23 = sld [smem:[#allocation28_spill]]  ;;  %s2175_s12 = scalar_lea.vmem %s2713_s17, 256 }
  0xb2   : > { %1679 = vmatpush3.bf16.msra.mxu0 %v1920_v16  ;;  %v1560_v41 = vld [vmem:[%s2773_s6] ss:$0 sm:$0xff]  ;;  %v1933_v46 = vld [vmem:[#allocation5 + $0x8] sm:$0xff]   ;;  %v1935_v55 = vld [vmem:[#allocation7 + $0x38] sm:$0xff]   ;;  %p2176_p7 = scmp.ne.s32.totalorder %s2713_s17, %s2175_s12  ;;  %s2282_s10 = smov [#allocation14]  }
  0xb3   : > { %1680 = vmatprep.subr.bf16.mxu0 %v2280_v3  ;;  %v1934_v47 = vld [vmem:[#allocation5] sm:$0xff]   ;;  %v1936_v56 = vld [vmem:[#allocation7 + $0x30] sm:$0xff]   ;;  %v1937_v63 = vld [vmem:[#allocation7 + $0x28] sm:$0xff]  }
  0xb4   : > { %1699 = vmatpush3.bf16.msra.mxu1 %v1928_v24  ;;  %v1938_v2 = vld [vmem:[#allocation7 + $0x20] sm:$0xff]   ;;  %v1939_v4 = vld [vmem:[#allocation7 + $0x18] sm:$0xff]   ;;  %v1948_v23 = vld [vmem:[#allocation10 + $0x10] sm:$0xff]   ;;  %p2177_p6 = pnand %p2176_p7, %p2549_p8 }
  0xb5   : > { %1700 = vmatprep.subr.bf16.mxu1 %v2280_v3  ;;  %v1949_v24 = vld [vmem:[#allocation10 + $0x8] sm:$0xff]   ;;  %s1621_s22 = sshll.u32 %s2827_s13, 8 }
  0xb6   : > { %1681 = vmatpush3.bf16.msra.mxu0 %v1921_v17  ;;  %v1957_v5 = vld [vmem:[#allocation11 + $0x8] sm:$0xff]   ;;  %p2178_p12 = pneg %p2177_p6 }
  0xb7   : > { %1682 = vmatprep.subr.bf16.mxu0 %v2280_v3 }
  0xb8   : > { %1701 = vmatpush3.bf16.msra.mxu1 %v1929_v25  ;;  %v1950_v25 = vld [vmem:[#allocation10] sm:$0xff]  }
  0xb9   : > { %1702 = vmatprep.subr.bf16.mxu1 %v2280_v3 }
  0xba   : > { %1683 = vmatpush3.bf16.msra.mxu0 %v1922_v18  ;;  %v1943_v18 = vld [vmem:[#allocation10 + $0x38] sm:$0xff]  }
  0xbb   : > { %1684 = vmatprep.subr.bf16.mxu0 %v2280_v3 }
  0xbc   : > { %1703 = vmatpush3.bf16.msra.mxu1 %v1930_v26 }
  0xbd   : > { %1704 = vmatprep.subr.bf16.mxu1 %v2280_v3 }
  0xbe   : > { %1685 = vmatpush3.bf16.msra.mxu0 %v1923_v19  ;;  %v1944_v19 = vld [vmem:[#allocation10 + $0x30] sm:$0xff]  }
  0xbf   : > { %1686 = vmatprep.subr.bf16.mxu0 %v2280_v3 }
  0xc0   : > { %1705 = vmatpush3.bf16.msra.mxu1 %v1931_v27 }
  0xc1   : > { %1706 = vmatprep.subr.bf16.mxu1 %v2280_v3 }
  0xc2   : > { %1687 = vmatpush3.bf16.msra.mxu0 %v1924_v20  ;;  %v1945_v20 = vld [vmem:[#allocation10 + $0x28] sm:$0xff]  }
  0xc3   : > { %1688 = vmatprep.subr.bf16.mxu0 %v2280_v3 }
  0xc4   : > { %1707 = vmatpush3.bf16.msra.mxu1 %v1932_v28 }
  0xc5   : > { %1708 = vmatprep.subr.bf16.mxu1 %v2280_v3 }
  0xc6   : > { %1689 = vmatpush3.bf16.msra.mxu0 %v1925_v21  ;;  %v1946_v21 = vld [vmem:[#allocation10 + $0x20] sm:$0xff]  }
  0xc7   : > { %1690 = vmatprep.subr.bf16.mxu0 %v2280_v3 }
  0xc8   : > { %1709 = vmatpush3.bf16.msra.mxu1 %v1933_v46 }
  0xc9   : > { %1710 = vmatprep.subr.bf16.mxu1 %v2280_v3 }
  0xca   : > { %1691 = vmatpush3.bf16.msra.mxu0 %v1926_v22  ;;  %v1947_v22 = vld [vmem:[#allocation10 + $0x18] sm:$0xff]  }
  0xcb   : > { %1716 = vmatprep.subr.bf16.mxu0 %v2280_v3 }
  0xcc   : > { %1711 = vmatpush3.bf16.msra.mxu1 %v1934_v47 }
  0xcd   : > { %1736 = vmatprep.subr.bf16.mxu1 %v2280_v3 }
 0x136   : > { %v623_v6 = vpop.xlane.xlu0 %622 }
 0x137   : > { %v626_v7 = vmul.f32 0.03125, %v623_v6  ;;  %v1940_v6 = vld [vmem:[#allocation7 + $0x10] sm:$0xff]  }
 0x139   : > { %v628_v8 = vsub.f32 %v2601_v0, %v626_v7  ;;  %v1941_v7 = vld [vmem:[#allocation7 + $0x8] sm:$0xff]  }
 0x13a   : > { %v625_v9 = vpop.xlane.xlu0 %624 }
 0x13b   : > { %v627_v10 = vmul.f32 0.03125, %v625_v9  ;;  %v632_v11 = vsel %vm619_vm0, %v628_v8, 0.0  ;;  %v1942_v8 = vld [vmem:[#allocation7] sm:$0xff]  }
 0x13c   : > { %v634_v12 = vmul.f32 %v632_v11, %v632_v11 }
 0x13d   : > { %v629_v13 = vsub.f32 %v2603_v1, %v627_v10 }
 0x13e   : > { %636 = vadd.xlane.f32.xlu1 %v634_v12 }
 0x13f   : > { %v633_v14 = vsel %vm619_vm0, %v629_v13, 0.0 }
 0x140   : > { %v635_v15 = vmul.f32 %v633_v14, %v633_v14 }
 0x142   : > { %638 = vadd.xlane.f32.xlu1 %v635_v15 }
 0x1c7   : > { %v637_v29 = vpop.xlane.xlu1 %636 }
 0x1c8   : > { %v640_v30 = vmul.f32 0.03125, %v637_v29 }
 0x1ca   : > { %v642_v31 = vadd.f32 1e-05, %v640_v30 }
 0x1cb   : > { %v639_v32 = vpop.xlane.xlu1 %638 }
 0x1cc   : > { %1967 = vrsqrt.f32 %v642_v31  ;;  %v641_v33 = vmul.f32 0.03125, %v639_v32 }
 0x1ce   : > { %v643_v34 = vadd.f32 1e-05, %v641_v33 }
 0x1d0   : > { %1969 = vrsqrt.f32 %v643_v34 }
 0x1d9   : > { %v1968_v35 = vpop.eup %1967 }
 0x1da   : > { %v646_v36 = vmul.f32 %v1968_v35, %v632_v11 }
 0x1dc   : > { %v654_v40 = vmul.f32 %v1559_v37, %v646_v36 }
 0x1dd   : > { %v1970_v38 = vpop.eup %1969 }
 0x1de   : > { %v647_v39 = vmul.f32 %v1970_v38, %v633_v14  ;;  %v662_v43 = vadd.f32 %v1560_v41, %v654_v40 }
 0x1e0   : > { %v655_v42 = vmul.f32 %v1559_v37, %v647_v39 }
 0x1e2   : > { %v663_v44 = vadd.f32 %v1560_v41, %v655_v42 }
 0x1e4   : > { %v664_v45 = vpack.c.bf16 %v663_v44, %v662_v43  ;;  %v1951_v43 = vld [vmem:[#allocation11 + $0x38] sm:$0xff]  }
 0x1e6   : > { %1693 = vmatmul.mubr.bf16.vlgmr.msra.gmra.mxu0 %v664_v45 }
 0x1e7   : > { %1732 = vmatprep.mubr.msk.bf16.mxu0 %vm2281_vm1, %v2280_v3  ;;  %1717 = vmatpush3.bf16.msra.mxu0 %v1935_v55  ;;  %v1955_v55 = vld [vmem:[#allocation11 + $0x18] sm:$0xff]  }
 0x1e8   : > { %1718 = vmatprep.subr.bf16.mxu0 %v2280_v3 }
 0x1eb   : > { %1719 = vmatpush3.bf16.msra.mxu0 %v1936_v56  ;;  %v1956_v56 = vld [vmem:[#allocation11 + $0x10] sm:$0xff]  }
 0x1ec   : > { %1720 = vmatprep.subr.bf16.mxu0 %v2280_v3 }
 0x1ef   : > { %1721 = vmatpush3.bf16.msra.mxu0 %v1937_v63 }
 0x1f0   : > { %1722 = vmatprep.subr.bf16.mxu0 %v2280_v3 }
 0x1f3   : > { %1723 = vmatpush3.bf16.msra.mxu0 %v1938_v2 }
 0x1f4   : > { %1724 = vmatprep.subr.bf16.mxu0 %v2280_v3 }
 0x1f7   : > { %1725 = vmatpush3.bf16.msra.mxu0 %v1939_v4 }
 0x1f8   : > { %1726 = vmatprep.subr.bf16.mxu0 %v2280_v3 }
 0x1fb   : > { %1727 = vmatpush3.bf16.msra.mxu0 %v1940_v6  ;;  %v1593_v6 = vld [vmem:[%s2774_s7] ss:$0 sm:$0xff] }
 0x1fc   : > { %1728 = vmatprep.subr.bf16.mxu0 %v2280_v3 }
 0x1ff   : > { %1729 = vmatpush3.bf16.msra.mxu0 %v1941_v7 }
 0x200   : > { %1730 = vmatprep.subr.bf16.mxu0 %v2280_v3 }
 0x203   : > { %1731 = vmatpush3.bf16.msra.mxu0 %v1942_v8 }
 0x204   : > { %1756 = vmatprep.subr.bf16.mxu0 %v2280_v3 }
 0x2a6   : > { %v763_v48 = vpop.f32.mrf.mxu0 }
 0x2a7   : > { %v770_v51 = vmul.f32 0.17677669, %v763_v48 }
 0x2a8   : > { %v1694_v49 = vpop.f32.mrf.mxu0 }
 0x2aa   : > { %v766_v50 = vpop.f32.mrf.mxu0 }
 0x2ab   : > { %v771_v52 = vmul.f32 0.17677669, %v766_v50 }
 0x2ac   : > { %v1695_v53 = vpop.f32.mrf.mxu0 }
 0x2ad   : > { %v772_v54 = vpack.c.bf16 %v771_v52, %v770_v51  ;;  %v1952_v52 = vld [vmem:[#allocation11 + $0x30] sm:$0xff]   ;;  %v1953_v53 = vld [vmem:[#allocation11 + $0x28] sm:$0xff]  }
 0x2af   : > { %1713 = vmatmul.mubr.bf16.vlgmr.msra.gmra.mxu1 %v772_v54  ;;  %v1954_v54 = vld [vmem:[#allocation11 + $0x20] sm:$0xff]  }
 0x2b0   : > { %1752 = vmatprep.mubr.msk.bf16.mxu1 %vm2281_vm1, %v2280_v3  ;;  %1737 = vmatpush3.bf16.msra.mxu1 %v1943_v18  ;;  %v1962_v18 = vld [vmem:[#allocation13 + $0x20] sm:$0xff]  }
 0x2b1   : > { %1738 = vmatprep.subr.bf16.mxu1 %v2280_v3 }
 0x2b4   : > { %1739 = vmatpush3.bf16.msra.mxu1 %v1944_v19  ;;  %v1963_v19 = vld [vmem:[#allocation13 + $0x18] sm:$0xff]  }
 0x2b5   : > { %1740 = vmatprep.subr.bf16.mxu1 %v2280_v3 }
 0x2b8   : > { %1741 = vmatpush3.bf16.msra.mxu1 %v1945_v20  ;;  %v1964_v20 = vld [vmem:[#allocation13 + $0x10] sm:$0xff]  }
 0x2b9   : > { %1742 = vmatprep.subr.bf16.mxu1 %v2280_v3 }
 0x2bc   : > { %1743 = vmatpush3.bf16.msra.mxu1 %v1946_v21  ;;  %v1965_v21 = vld [vmem:[#allocation13 + $0x8] sm:$0xff]  }
 0x2bd   : > { %1744 = vmatprep.subr.bf16.mxu1 %v2280_v3 }
 0x2c0   : > { %1745 = vmatpush3.bf16.msra.mxu1 %v1947_v22  ;;  %v1966_v22 = vld [vmem:[#allocation13] sm:$0xff]  }
 0x2c1   : > { %1746 = vmatprep.subr.bf16.mxu1 %v2280_v3 }
 0x2c4   : > { %1747 = vmatpush3.bf16.msra.mxu1 %v1948_v23  ;;  %v1595_v23 = vld [vmem:[%s2826_s20] ss:$0 sm:$0xff]  ;;  %s2179_s20 = sshll.u32 %s2282_s10, 4  ;;  %s2180_s20 = int_to_ptr.vmem [resolvable:$false] %s2179_s20 }
 0x2c5   : > { %1748 = vmatprep.subr.bf16.mxu1 %v2280_v3  ;;  %s2181_s13 = scalar_lea.vmem %s2180_s20, 512  ;;  %p2182_p0 = scmp.lt.s32.totalorder %s2713_s17, %s2180_s20 }
 0x2c6   : > { %p2183_p13 = scmp.lt.s32.totalorder %s2181_s13, %s2175_s12 }
 0x2c8   : > { %1749 = vmatpush3.bf16.msra.mxu1 %v1949_v24  ;;  %p2184_p11 = por %p2183_p13, %p2182_p0 }
 0x2c9   : > { %1750 = vmatprep.subr.bf16.mxu1 %v2280_v3 }
 0x2ca   : > { %p2185_p1 = pnand %p2184_p11, %p2178_p12 }
 0x2cc   : > { %1751 = vmatpush3.bf16.msra.mxu1 %v1950_v25 }
 0x2cd   : > { %1776 = vmatprep.subr.bf16.mxu1 %v2280_v3 }
 0x36f   : > { %v855_v57 = vpop.f32.mrf.mxu1 }
 0x370   : > { %v863_v58 = vsel %vm862_vm2, %v855_v57, -1e+30  ;;  %v1958_v57 = vld [vmem:[#allocation11] sm:$0xff]  }
 0x371   : > { %865 = vmax.xlane.f32.xlu0 %v863_v58  ;;  %v1714_v59 = vpop.f32.mrf.mxu1 }
 0x373   : > { %v858_v60 = vpop.f32.mrf.mxu1 }
 0x374   : > { %v864_v61 = vsel %vm862_vm2, %v858_v60, -1e+30 }
 0x375   : > { %867 = vmax.xlane.f32.xlu1 %v864_v61  ;;  %v1715_v62 = vpop.f32.mrf.mxu1 }
 0x3fa   : > { %v866_v9 = vpop.xlane.xlu0 %865 }
 0x3fb   : > { %v869_v10 = vsub.f32 %v863_v58, %v866_v9 }
 0x3fd   : > { %v871_v11 = vmul.f32 1.442695, %v869_v10  ;;  %v1594_v10 = vld [vmem:[%s2825_s8] ss:$0 sm:$0xff]  ;;  %s2719_s8 = scalar_lea.hbm %s2829_s23, %s1621_s22 }
 0x3fe   : > { %v868_v12 = vpop.xlane.xlu1 %867 }
 0x3ff   : > { %1971 = vpow2.f32 %v871_v11  ;;  %v870_v13 = vsub.f32 %v864_v61, %v868_v12 }
 0x401   : > { %v873_v14 = vmul.f32 1.442695, %v870_v13 }
 0x403   : > { %1973 = vpow2.f32 %v873_v14 }
 0x40c   : > { %v1972_v15 = vpop.eup %1971 }
 0x40d   : > { %875 = vadd.xlane.f32.xlu0 %v1972_v15 }
 0x410   : > { %v1974_v16 = vpop.eup %1973 }
 0x411   : > { %877 = vadd.xlane.f32.xlu1 %v1974_v16  ;;  %v879_v17 = vpack.c.bf16 %v1974_v16, %v1972_v15  ;;  %v1959_v15 = vld [vmem:[#allocation13 + $0x38] sm:$0xff]   ;;  %v1960_v16 = vld [vmem:[#allocation13 + $0x30] sm:$0xff]  }
 0x413   : > { %1733 = vmatmul.mubr.bf16.vlgmr.msra.gmra.mxu0 %v879_v17  ;;  %v1961_v17 = vld [vmem:[#allocation13 + $0x28] sm:$0xff]  }
 0x414   : > { %1772 = vmatprep.mubr.msk.bf16.mxu0 %vm2281_vm1, %v2280_v3  ;;  %1757 = vmatpush3.bf16.msra.mxu0 %v1951_v43 }
 0x415   : > { %1758 = vmatprep.subr.bf16.mxu0 %v2280_v3 }
 0x418   : > { %1759 = vmatpush3.bf16.msra.mxu0 %v1952_v52 }
 0x419   : > { %1760 = vmatprep.subr.bf16.mxu0 %v2280_v3 }
 0x41c   : > { %1761 = vmatpush3.bf16.msra.mxu0 %v1953_v53 }
 0x41d   : > { %1762 = vmatprep.subr.bf16.mxu0 %v2280_v3 }
 0x420   : > { %1763 = vmatpush3.bf16.msra.mxu0 %v1954_v54 }
 0x421   : > { %1764 = vmatprep.subr.bf16.mxu0 %v2280_v3 }
 0x424   : > { %1765 = vmatpush3.bf16.msra.mxu0 %v1955_v55 }
 0x425   : > { %1766 = vmatprep.subr.bf16.mxu0 %v2280_v3 }
 0x428   : > { %1767 = vmatpush3.bf16.msra.mxu0 %v1956_v56 }
 0x429   : > { %1768 = vmatprep.subr.bf16.mxu0 %v2280_v3 }
 0x42c   : > { %1769 = vmatpush3.bf16.msra.mxu0 %v1957_v5 }
 0x42d   : > { %1770 = vmatprep.subr.bf16.mxu0 %v2280_v3 }
 0x430   : > { %1771 = vmatpush3.bf16.msra.mxu0 %v1958_v57 }
 0x496   : > { %v876_v26 = vpop.xlane.xlu0 %875 }
 0x497   : > { %1975 = vrcp.f32 %v876_v26 }
 0x49a   : > { %v878_v27 = vpop.xlane.xlu1 %877 }
 0x49b   : > { %1977 = vrcp.f32 %v878_v27 }
 0x4a4   : > { %v1976_v30 = vpop.eup %1975 }
 0x4a8   : > { %v1978_v31 = vpop.eup %1977 }
 0x4d3   : > { %v962_v28 = vpop.f32.mrf.mxu0 }
 0x4d4   : > { %v971_v33 = vmul.f32 %v1976_v30, %v962_v28 }
 0x4d5   : > { %v1734_v29 = vpop.f32.mrf.mxu0 }
 0x4d7   : > { %v965_v32 = vpop.f32.mrf.mxu0 }
 0x4d8   : > { %v972_v34 = vmul.f32 %v1978_v31, %v965_v32 }
 0x4d9   : > { %v1735_v35 = vpop.f32.mrf.mxu0 }
 0x4da   : > { %v973_v36 = vpack.c.bf16 %v972_v34, %v971_v33 }
 0x4dc   : > { %1753 = vmatmul.mubr.bf16.vlgmr.msra.gmra.mxu1 %v973_v36 }
 0x4dd   : > { %1792 = vmatprep.mubr.msk.bf16.mxu1 %vm2281_vm1, %v2280_v3  ;;  %1777 = vmatpush3.bf16.msra.mxu1 %v1959_v15 }
 0x4de   : > { %1778 = vmatprep.subr.bf16.mxu1 %v2280_v3 }
 0x4e1   : > { %1779 = vmatpush3.bf16.msra.mxu1 %v1960_v16 }
 0x4e2   : > { %1780 = vmatprep.subr.bf16.mxu1 %v2280_v3 }
 0x4e5   : > { %1781 = vmatpush3.bf16.msra.mxu1 %v1961_v17 }
 0x4e6   : > { %1782 = vmatprep.subr.bf16.mxu1 %v2280_v3 }
 0x4e9   : > { %1783 = vmatpush3.bf16.msra.mxu1 %v1962_v18 }
 0x4ea   : > { %1784 = vmatprep.subr.bf16.mxu1 %v2280_v3 }
 0x4ed   : > { %1785 = vmatpush3.bf16.msra.mxu1 %v1963_v19 }
 0x4ee   : > { %1786 = vmatprep.subr.bf16.mxu1 %v2280_v3 }
 0x4f1   : > { %1787 = vmatpush3.bf16.msra.mxu1 %v1964_v20 }
 0x4f2   : > { %1788 = vmatprep.subr.bf16.mxu1 %v2280_v3 }
 0x4f5   : > { %1789 = vmatpush3.bf16.msra.mxu1 %v1965_v21 }
 0x4f6   : > { %1790 = vmatprep.subr.bf16.mxu1 %v2280_v3 }
 0x4f9   : > { %1791 = vmatpush3.bf16.msra.mxu1 %v1966_v22 }
 0x59c   : > { %v1072_v37 = vpop.f32.mrf.mxu1 }
 0x59d   : > { %v2670_v38 = vadd.f32 %v1072_v37, %v2601_v0 }
 0x59e   : > { %v1754_v39 = vpop.f32.mrf.mxu1 }
 0x59f   : > { %1083 = vadd.xlane.f32.xlu0 %v2670_v38 }
 0x5a0   : > { %v1075_v40 = vpop.f32.mrf.mxu1 }
 0x5a1   : > { %v2674_v41 = vadd.f32 %v1075_v40, %v2603_v1 }
 0x5a2   : > { %v1755_v42 = vpop.f32.mrf.mxu1 }
 0x5a3   : > { %1085 = vadd.xlane.f32.xlu1 %v2674_v41 }
 0x628   : > { %v1084_v44 = vpop.xlane.xlu0 %1083 }
 0x629   : > { %v1087_v45 = vmul.f32 0.03125, %v1084_v44 }
 0x62b   : > { %v1089_v46 = vsub.f32 %v2670_v38, %v1087_v45 }
 0x62c   : > { %v1086_v0 = vpop.xlane.xlu1 %1085 }
 0x62d   : > { %v1088_v47 = vmul.f32 0.03125, %v1086_v0  ;;  %v1091_v48 = vsel %vm619_vm0, %v1089_v46, 0.0 }
 0x62e   : > { %v1093_v49 = vmul.f32 %v1091_v48, %v1091_v48 }
 0x62f   : > { %v1090_v1 = vsub.f32 %v2674_v41, %v1088_v47 }
 0x630   : > { %1095 = vadd.xlane.f32.xlu0 %v1093_v49 }
 0x631   : > { %v1092_v50 = vsel %vm619_vm0, %v1090_v1, 0.0  ;;  %v1612_v1 = vld [vmem:[%s2828_s18] ss:$0 sm:$0xff] }
 0x632   : > { %v1094_v51 = vmul.f32 %v1092_v50, %v1092_v50 }
 0x634   : > { %1097 = vadd.xlane.f32.xlu1 %v1094_v51 }
 0x6b9   : > { %v1096_v58 = vpop.xlane.xlu0 %1095 }
 0x6ba   : > { %v1099_v59 = vmul.f32 0.03125, %v1096_v58 }
 0x6bc   : > { %v1101_v60 = vadd.f32 1e-05, %v1099_v59 }
 0x6bd   : > { %v1098_v61 = vpop.xlane.xlu1 %1097 }
 0x6be   : > { %1979 = vrsqrt.f32 %v1101_v60  ;;  %v1100_v62 = vmul.f32 0.03125, %v1098_v61 }
 0x6c0   : > { %v1102_v63 = vadd.f32 1e-05, %v1100_v62 }
 0x6c2   : > { %1981 = vrsqrt.f32 %v1102_v63 }
 0x6cb   : > { %v1980_v2 = vpop.eup %1979 }
 0x6cc   : > { %v1105_v4 = vmul.f32 %v1980_v2, %v1091_v48 }
 0x6ce   : > { %v1113_v9 = vmul.f32 %v1593_v6, %v1105_v4 }
 0x6cf   : > { %v1982_v7 = vpop.eup %1981 }
 0x6d0   : > { %v1106_v8 = vmul.f32 %v1982_v7, %v1092_v50  ;;  %v1121_v12 = vadd.f32 %v1594_v10, %v1113_v9 }
 0x6d2   : > { %v1114_v11 = vmul.f32 %v1593_v6, %v1106_v8 }
 0x6d4   : > { %v1122_v13 = vadd.f32 %v1594_v10, %v1114_v11 }
 0x6d6   : > { %v1123_v14 = vpack.c.bf16 %v1122_v13, %v1121_v12 }
 0x6d8   : > { %1773 = vmatmul.mubr.bf16.vlgmr.msra.gmra.mxu0 %v1123_v14 }
 0x798   : > { %v1229_v24 = vpop.f32.mrf.mxu0 }
 0x799   : > { %v1230_v25 = vadd.f32 %v1595_v23, %v1229_v24 }
 0x79a   : > { %v1774_v26 = vpop.f32.mrf.mxu0 }
 0x79b   : > { %v1236_v27 = vmul.f32 %v1230_v25, %v1230_v25 }
 0x79c   : > { %v1232_v28 = vpop.f32.mrf.mxu0 }
 0x79d   : > { %v1238_v29 = vmul.f32 %v1236_v27, %v1230_v25  ;;  %v1233_v30 = vadd.f32 %v1595_v23, %v1232_v28 }
 0x79e   : > { %v1775_v31 = vpop.f32.mrf.mxu0 }
 0x79f   : > { %v1240_v32 = vmul.f32 0.044715, %v1238_v29  ;;  %v1237_v33 = vmul.f32 %v1233_v30, %v1233_v30 }
 0x7a1   : > { %v1242_v34 = vadd.f32 %v1240_v32, %v1230_v25  ;;  %v1239_v35 = vmul.f32 %v1237_v33, %v1233_v30 }
 0x7a3   : > { %v1244_v36 = vmul.f32 0.7978846, %v1242_v34  ;;  %v1241_v3 = vmul.f32 0.044715, %v1239_v35 }
 0x7a5   : > { %1983 = vtanh.f32 %v1244_v36  ;;  %v1243_v37 = vadd.f32 %v1241_v3, %v1233_v30 }
 0x7a7   : > { %v1245_v39 = vmul.f32 0.7978846, %v1243_v37 }
 0x7a9   : > { %1985 = vtanh.f32 %v1245_v39 }
 0x7b2   : > { %v1984_v40 = vpop.eup %1983 }
 0x7b3   : > { %v1248_v42 = vadd.f32 1.0, %v1984_v40 }
 0x7b5   : > { %v1250_v44 = vmul.f32 0.5, %v1248_v42 }
 0x7b6   : > { %v1986_v43 = vpop.eup %1985 }
 0x7b7   : > { %v1249_v45 = vadd.f32 1.0, %v1986_v43  ;;  %v1252_v0 = vmul.f32 %v1250_v44, %v1230_v25 }
 0x7b9   : > { %v1251_v46 = vmul.f32 0.5, %v1249_v45 }
 0x7bb   : > { %v1253_v47 = vmul.f32 %v1251_v46, %v1233_v30 }
 0x7bd   : > { %v1254_v48 = vpack.c.bf16 %v1253_v47, %v1252_v0 }
 0x7bf   : > { %1793 = vmatmul.mubr.bf16.vlgmr.msra.gmra.mxu1 %v1254_v48 }
 0x87f   : > { %v1353_v49 = vpop.f32.mrf.mxu1 }
 0x880   : > { %v1360_v50 = vadd.f32 %v1353_v49, %v2670_v38 }
 0x881   : > { %v1794_v51 = vpop.f32.mrf.mxu1 }
 0x882   : > { %v1369_v52 = vadd.f32 %v1612_v1, %v1360_v50 }
 0x883   : > { %v1356_v53 = vpop.f32.mrf.mxu1 }
 0x884   : > { %1371 = vst [vmem:[%s579_s21] sm:$0xff] %v1369_v52  ;;  %v1361_v54 = vadd.f32 %v1356_v53, %v2674_v41 }
 0x885   : > { %v1795_v55 = vpop.f32.mrf.mxu1 }
 0x886   : > { %v1370_v38 = vadd.f32 %v1612_v1, %v1361_v54 }
 0x888   : > { %1372 = vst [vmem:[%s579_s21 + $0x8] sm:$0xff] %v1370_v38 }
 0x889   : > { %2188 = shalt.err (!%p2185_p1)
}
 0x88a   : > { %s2189_s15 = scalar_lea.hbm %s2719_s8, 256  ;;  %s2193_s21 = scalar_lea.hbm %s2829_s23, 512 }
 0x88b   : > { %p2190_p9 = scmp.ne.s32.totalorder %s2719_s8, %s2189_s15  ;;  %p2194_p4 = scmp.lt.s32.totalorder %s2719_s8, %s2829_s23 }
 0x88c   : > { %p2195_p10 = scmp.lt.s32.totalorder %s2193_s21, %s2189_s15 }
 0x88d   : > { %p2191_p3 = pnand %p2190_p9, %p2549_p8 }
 0x88e   : > { %p2196_p5 = por %p2195_p10, %p2194_p4 }
 0x88f   : > { %p2192_p2 = pneg %p2191_p3 }
 0x891   : > { %p2197_p7 = pnand %p2196_p5, %p2192_p2 }
 0x893   : > { %2200 = shalt.err (!%p2197_p7)
}
 0x894   : > { %s2283_s1 = smov 128   ;;  %s2284_s12 = smov 8  }
 0x895   : > { %1818 = dma.vmem_to_hbm [thread:$0]  (%p2549_p8), %s2713_s17, 256, %s2719_s8, %s1374_s24, %s2283_s1, %s2283_s1, %s2284_s12  }
 0x896 PF: > { %s2830_s10 = sld [smem:[#allocation20_spill]]  ;;  %p2833_p12 = scmp.ge.s32.totalorder %s2267_s30, 2 }
 0x897   : > { %s2831_s20 = sld [smem:[#allocation22_spill]] }
 0x89c   : > { %s1404_s13 = sand.u32 1, %s2830_s10  }
 0x89d   : > { %p2832_p6 = scmp.ne.s32.totalorder %s2831_s20, 0  ;;  %s1405_s15 = scalar_lea.sflag [#allocation4], %s1404_s13 }
 0x89f   : > { %p1844_p0 = pnand %p2833_p12, %p2832_p6 }
 0x8a1   : > { %p1845_p13 = pneg %p1844_p0 }
 0x8a3   : > { %2242 = dma.done.wait (%p1845_p13), %s1405_s15, 256  }
 0x8a4   : > { %2244 = vsyncadd (%p1845_p13), %s1405_s15, 4294967040  ;;  %s32_s30 = sadd.s32 1, %s2267_s30   ;;  %s2834_s19 = smov %s2841_s28 }
 0x8a5   : > { %p29_p11 = scmp.ge.s32.totalorder %s32_s30, 4   ;;  %s2835_s25 = smov %s2251_s26 }
 0x8a6   : > { %s2836_s26 = smov %s2255_s27  ;;  %s2837_s27 = smov %s2561_s14 }
 0x8a7   : > { %s2838_s28 = smov %s2263_s29  ;;  %s2839_s29 = smov %s2834_s19 }
 0x8a8   :  { %31 = sbr.rel (!%p29_p11) target bundleno = 16 (0x10), region = 143 }
 0x8ad   :  { %1410 = vsyncpa [#allocation3], 1 }
 0x8ae   :  { %1412 = vsyncpa [#allocation3 + $0x1], 1 }
 0x8af   :  { %1413 = vsyncpa [#allocation6], 1 }
 0x8b0   :  { %1414 = vsyncpa [#allocation9], 1 }
 0x8b1   :  { %1415 = vsyncpa [#allocation12], 1 }
 0x8b2   :  { %1416 = vsyncpa [#allocation4], 1 }
 0x8b3   :  { %1418 = vsyncpa [#allocation4 + $0x1], 1 }

// kernel: tpu_custom_call.1
= control target key start
LH: loop header
LB: loop body
LE: loop exit
PB: predicated region body
PF: predicated region fallthrough
CT: control target
= control target key end

     0   :  { %s2808_s0 = inlined_call_operand.hbm [shape: f32[2,16,128], index: 0, kind: input, shape index: {}]   ;;  %s2809_s1 = inlined_call_operand.hbm [shape: bf16[2,128,128], index: 1, kind: input, shape index: {}]   ;;  %s2810_s2 = inlined_call_operand.hbm [shape: bf16[2,128,128], index: 2, kind: input, shape index: {}]   ;;  %s2811_s3 = inlined_call_operand.hbm [shape: bf16[128,128], index: 3, kind: input, shape index: {}]   ;;  %s2812_s4 = inlined_call_operand.hbm [shape: bf16[128,128], index: 4, kind: input, shape index: {}]   ;;  %s2813_s5 = inlined_call_operand.vmem [shape: f32[1,128], index: 5, kind: input, shape index: {}]   ;;  %s2814_s6 = inlined_call_operand.vmem [shape: f32[1,128], index: 6, kind: input, shape index: {}]   ;;  %s2815_s7 = inlined_call_operand.vmem [shape: f32[1,128], index: 7, kind: input, shape index: {}]   ;;  %s2816_s8 = inlined_call_operand.vmem [shape: f32[1,128], index: 8, kind: input, shape index: {}]   ;;  %s2817_s9 = inlined_call_operand.hbm [shape: bf16[128,128], index: 9, kind: input, shape index: {}]   ;;  %s2818_s10 = inlined_call_operand.vmem [shape: f32[1,128], index: 10, kind: input, shape index: {}]   ;;  %s2819_s11 = inlined_call_operand.hbm [shape: bf16[128,128], index: 11, kind: input, shape index: {}]   ;;  %s2820_s12 = inlined_call_operand.vmem [shape: f32[1,128], index: 12, kind: input, shape index: {}]   ;;  %s2821_s13 = inlined_call_operand.hbm [shape: f32[2,16,128], index: 13, kind: output, shape index: {}]  }
   0x1   :  { %2838 = sst [smem:[#allocation28_spill]] %s2809_s1 }
   0x2   :  { %2839 = sst [smem:[#allocation29_spill]] %s2811_s3 }
   0x3   :  { %2840 = sst [smem:[#allocation30_spill]] %s2815_s7 }
   0x4   :  { %2841 = sst [smem:[#allocation31_spill]] %s2816_s8 }
   0x5   :  { %2842 = sst [smem:[#allocation32_spill]] %s2817_s9 }
   0x6   :  { %2843 = sst [smem:[#allocation33_spill]] %s2818_s10 }
   0x7   :  { %2844 = sst [smem:[#allocation34_spill]] %s2820_s12 }
   0x8   :  { %2845 = sst [smem:[#allocation35_spill]] %s2821_s13 }
   0x9   :  { %18 = vsyncpa [#allocation3], 0 }
   0xa   :  { %20 = vsyncpa [#allocation3 + $0x1], 0 }
   0xb   :  { %21 = vsyncpa [#allocation6], 0 }
   0xc   :  { %23 = vsyncpa [#allocation6 + $0x1], 0 }
   0xd   :  { %24 = vsyncpa [#allocation9], 0 }
   0xe   :  { %25 = vsyncpa [#allocation12], 0 }
   0xf   :  { %26 = vsyncpa [#allocation4], 0 }
  0x10   :  { %28 = vsyncpa [#allocation4 + $0x1], 0  ;;  %s2409_s25 = smov 0   ;;  %s2411_s26 = smov 0  }
  0x11   :  { %s2413_s27 = smov 0   ;;  %s2415_s28 = smov 0  }
  0x12   :  { %s2417_s29 = smov 0   ;;  %s2419_s30 = smov 0  }
  0x13 LB: > { %2846 = sst [smem:[#allocation20_spill]] %s2301_s25  ;;  %s2440_s14 = sadd.s32 4294967295, %s2321_s30   ;;  %s2321_s30 = sphi %s2419_s30, %s34_s30   ;;  %s2317_s29 = sphi %s2417_s29, %s2891_s29   ;;  %s2313_s28 = sphi %s2415_s28, %s2890_s28   ;;  %s2309_s27 = sphi %s2413_s27, %s2886_s27   ;;  %s2305_s26 = sphi %s2411_s26, %s2889_s26   ;;  %s2301_s25 = sphi %s2409_s25, %s2888_s25  }
  0x14   : > { %2847 = sst [smem:[#allocation21_spill]] %s2309_s27  ;;  %s1590_s15 = sadd.s32 4294967294, %s2321_s30  }
  0x15   : > { %2848 = sst [smem:[#allocation22_spill]] %s2313_s28  ;;  %p68_p0 = scmp.ne.s32.totalorder %s2305_s26, %s2301_s25 }
  0x16   : > { %2849 = sst [smem:[#allocation23_spill]] %s2321_s30  ;;  %p2825_p1 = scmp.eq.s32.totalorder %s2440_s14, 0 }
  0x17   : > { %p356_p2 = scmp.eq.s32.totalorder %s2440_s14, 1  ;;  %p362_p3 = scmp.eq.s32.totalorder %s1590_s15, 1 }
  0x18   : > { %p2449_p4 = por %p2825_p1, %p68_p0  ;;  %p1591_p5 = scmp.ge.s32.totalorder %s2321_s30, 1 }
  0x19   : > { %p2454_p6 = por %p362_p3, %p68_p0  ;;  %p369_p7 = scmp.lt.s32.totalorder %s2321_s30, 3 }
  0x1a   : > { %s2323_s19 = smov [#allocation8]   ;;  %s2324_s22 = smov [#allocation11]  }
  0x1b   : > { %s2851_s17 = scalar_select %p2454_p6, 1, 0 }
  0x1c   : > { %p2459_p8 = pnand %p1591_p5, %p369_p7  ;;  %s381_s20 = sshll.u32 %s2323_s19, 4  ;;  %s382_s20 = int_to_ptr.vmem [resolvable:$true] %s381_s20 }
  0x1d   : > { %2852 = sst [smem:[#allocation24_spill]] %s2851_s17  ;;  %s419_s23 = sshll.u32 %s2324_s22, 4  ;;  %s420_s23 = int_to_ptr.vmem [resolvable:$true] %s419_s23 }
  0x1e   : > { %p1876_p9 = pneg %p2459_p8  ;;  %s2052_s24 = scalar_lea.vmem %s382_s20, 1024 }
  0x1f   : > { %p2053_p13 = scmp.ne.s32.totalorder %s382_s20, %s2052_s24  ;;  %p2060_p5 = scmp.lt.s32.totalorder %s382_s20, %s382_s20 }
  0x20   : > { %p2468_p11 = pnand %p1876_p9, %p2825_p1  ;;  %p2061_p7 = scmp.lt.s32.totalorder %s2052_s24, %s2052_s24 }
  0x22   : > { %p2834_p12 = pneg %p2468_p11  ;;  %p2062_p10 = por %p2061_p7, %p2060_p5 }
  0x24   : > { %p2055_p0 = pnand %p2053_p13, %p2834_p12 }
  0x26   : > { %p2056_p3 = pneg %p2055_p0 }
  0x28   : > { %p2063_p9 = pnand %p2062_p10, %p2056_p3 }
  0x2a   : > { %2066 = shalt.err (!%p2063_p9)
}
  0x2b   : > { %s2826_s15 = smov 64   ;;  %s2828_s19 = smov 4  }
  0x2c   : > { %s2855_s3 = sld [smem:[#allocation29_spill]]  ;;  %s2078_s25 = scalar_lea.vmem %s420_s23, 1024 }
  0x2d   : > { %p2079_p13 = scmp.ne.s32.totalorder %s420_s23, %s2078_s25  ;;  %p2086_p10 = scmp.lt.s32.totalorder %s420_s23, %s420_s23 }
  0x2e   : > { %p2087_p3 = scmp.lt.s32.totalorder %s2078_s25, %s2078_s25 }
  0x2f   : > { %p2081_p0 = pnand %p2079_p13, %p2834_p12 }
  0x30   : > { %p2088_p7 = por %p2087_p3, %p2086_p10 }
  0x31   : > { %p2082_p5 = pneg %p2081_p0 }
  0x32   : > { %1879 = dma.hbm_to_vmem [thread:$0]  (!%p2468_p11), %s2855_s3, 1024, %s382_s20, [#allocation9], %s2826_s15, %s2826_s15, %s2828_s19  }
  0x33   : > { %p2089_p9 = pnand %p2088_p7, %p2082_p5 }
  0x35   : > { %2092 = shalt.err (!%p2089_p9)
}
  0x36   : > { %s2856_s9 = sld [smem:[#allocation32_spill]]  ;;  %s46_s25 = sadd.s32 1, %s2317_s29 }
  0x37   : > { %s55_s17 = sadd.s32 1, %s2309_s27  ;;  %p48_p13 = scmp.ge.s32.totalorder %s46_s25, 2 }
  0x38   : > { %p62_p0 = scmp.ne.s32.totalorder %s2309_s27, %s2305_s26  ;;  %p63_p5 = scmp.eq.s32.totalorder %s2321_s30, 0 }
  0x39   : > { %p1907_p10 = scmp.lt.s32.totalorder %s2321_s30, 2  ;;  %s2893_s25 = smov (%p48_p13, %s46_s25), 0 }
  0x3a   : > { %2857 = sst [smem:[#allocation25_spill]] %s2893_s25  ;;  %p64_p3 = por %p63_p5, %p62_p0 }
  0x3b   : > { %p2506_p7 = por %p356_p2, %p62_p0  ;;  %s50_s20 = ssub.s32 %s2317_s29, %s2893_s25 }
  0x3c   : > { %1885 = dma.hbm_to_vmem [thread:$0]  (!%p2468_p11), %s2856_s9, 1024, %s420_s23, [#allocation12], %s2826_s15, %s2826_s15, %s2828_s19  }
  0x3d   : > { %s2858_s13 = scalar_select %p2506_p7, 1, 0 }
  0x3e   : > { %s2513_s22 = sand.u32 1, %s2309_s27   ;;  %p53_p9 = scmp.eq.s32.totalorder %s50_s20, 0 }
  0x3f   : > { %2859 = sst [smem:[#allocation26_spill]] %s2858_s13  ;;  %p2515_p1 = pnand %p1907_p10, %p64_p3 }
  0x40   : > { %s475_s24 = sand.u32 1, %s2321_s30   ;;  %s1600_s15 = sshll.u32 %s2513_s22, 6 }
  0x41   : > { %s2522_s19 = scalar_select %p53_p9, %s2309_s27, %s55_s17  }
  0x42   : > { %s1675_s3 = sshll.u32 %s2317_s29, 10  ;;  %s2862_s1 = sld [smem:[#allocation28_spill]] }
  0x43   : > { %2861 = sst [smem:[#allocation27_spill]] %s2522_s19  ;;  %s479_s25 = scalar_lea.vmem [#allocation5], %s1600_s15 }
  0x44   : > { %s486_s28 = sshll.u32 %s479_s25, 4  ;;  %s2528_s10 = scalar_lea.sflag [#allocation6], %s475_s24  ;;  %s487_s28 = int_to_ptr.vmem [resolvable:$true] %s486_s28 }
  0x45   : > { %p2837_p2 = pneg %p2515_p1  ;;  %s2106_s20 = scalar_lea.vmem %s487_s28, 1024 }
  0x46   : > { %p2107_p13 = scmp.ne.s32.totalorder %s487_s28, %s2106_s20  ;;  %s2327_s17 = smov [#allocation5]  }
  0x47   : > { %s2111_s19 = sshll.u32 %s2327_s17, 4  ;;  %s2112_s19 = int_to_ptr.vmem [resolvable:$false] %s2111_s19 }
  0x48   : > { %s485_s13 = scalar_lea.hbm %s2862_s1, %s1675_s3  ;;  %p2109_p0 = pnand %p2107_p13, %p2837_p2 }
  0x49   : > { %s2113_s27 = scalar_lea.vmem %s2112_s19, 2048  ;;  %p2114_p10 = scmp.lt.s32.totalorder %s487_s28, %s2112_s19 }
  0x4a   : > { %p2110_p5 = pneg %p2109_p0  ;;  %p2115_p3 = scmp.lt.s32.totalorder %s2113_s27, %s2106_s20 }
  0x4c   : > { %p2116_p9 = por %p2115_p3, %p2114_p10 }
  0x4e   : > { %p2117_p12 = pnand %p2116_p9, %p2110_p5 }
  0x50   : > { %2120 = shalt.err (!%p2117_p12)
}
  0x51   : > { %s2863_s9 = smov 4   ;;  %s2864_s12 = smov 64  }
  0x52   : > { %1895 = dma.hbm_to_vmem [thread:$0]  (!%p2515_p1), %s485_s13, 1024, %s487_s28, %s2528_s10, %s2864_s12, %s2864_s12, %s2863_s9  }
  0x53   : > { %s2544_s1 = scalar_lea.hbm %s2810_s2, %s1675_s3  ;;  %s500_s17 = scalar_lea.vmem [#allocation7], %s1600_s15 }
  0x54   : > { %s507_s30 = sshll.u32 %s500_s17, 4  ;;  %s2328_s27 = smov [#allocation10]   ;;  %s2546_s30 = int_to_ptr.vmem [resolvable:$true] %s507_s30 }
  0x55   : > { %s394_s19 = sshll.u32 %s2328_s27, 4  ;;  %s2329_s20 = smov [#allocation13]   ;;  %s395_s19 = int_to_ptr.vmem [resolvable:$true] %s394_s19 }
  0x56   : > { %s435_s8 = sshll.u32 %s2329_s20, 4  ;;  %s2132_s7 = scalar_lea.vmem %s395_s19, 1024  ;;  %s436_s8 = int_to_ptr.vmem [resolvable:$true] %s435_s8 }
  0x57   : > { %p2133_p12 = scmp.ne.s32.totalorder %s395_s19, %s2132_s7  ;;  %p2865_p13 = pneg %p2468_p11 }
  0x58   : > { %p2140_p10 = scmp.lt.s32.totalorder %s395_s19, %s395_s19  ;;  %p2141_p3 = scmp.lt.s32.totalorder %s2132_s7, %s2132_s7 }
  0x59   : > { %p2135_p0 = pnand %p2133_p12, %p2865_p13 }
  0x5a   : > { %p2142_p9 = por %p2141_p3, %p2140_p10 }
  0x5b   : > { %p2136_p5 = pneg %p2135_p0 }
  0x5d   : > { %p2143_p2 = pnand %p2142_p9, %p2136_p5 }
  0x5f   : > { %2146 = shalt.err (!%p2143_p2)
}
  0x60   : > { %1882 = dma.hbm_to_vmem [thread:$0]  (!%p2468_p11), %s2812_s4, 1024, %s395_s19, [#allocation9], %s2864_s12, %s2864_s12, %s2863_s9  }
  0x61   : > { %s2158_s15 = scalar_lea.vmem %s436_s8, 1024  ;;  %p2866_p12 = pmov %p2865_p13 }
  0x62   : > { %p2159_p6 = scmp.ne.s32.totalorder %s436_s8, %s2158_s15  ;;  %p2166_p10 = scmp.lt.s32.totalorder %s436_s8, %s436_s8 }
  0x63   : > { %p2167_p5 = scmp.lt.s32.totalorder %s2158_s15, %s2158_s15 }
  0x64   : > { %p2161_p13 = pnand %p2159_p6, %p2866_p12 }
  0x65   : > { %p2168_p2 = por %p2167_p5, %p2166_p10 }
  0x66   : > { %p2162_p0 = pneg %p2161_p13 }
  0x68   : > { %p2169_p3 = pnand %p2168_p2, %p2162_p0 }
  0x6a   : > { %2172 = shalt.err (!%p2169_p3)
}
  0x6b   : > { %1888 = dma.hbm_to_vmem [thread:$0]  (!%p2468_p11), %s2819_s11, 1024, %s436_s8, [#allocation12], %s2864_s12, %s2864_s12, %s2863_s9  }
  0x6c   : > { %s1597_s25 = sshll.u32 %s2513_s22, 4  ;;  %s1674_s24 = sshll.u32 %s2317_s29, 8 }
  0x6d   : > { %s464_s19 = scalar_lea.hbm %s2808_s0, %s1674_s24  ;;  %s456_s20 = scalar_lea.vmem [#allocation2], %s1597_s25 }
  0x6e   : > { %s465_s3 = sshll.u32 %s456_s20, 4  ;;  %s453_s21 = scalar_lea.sflag [#allocation3], %s2513_s22  ;;  %s466_s3 = int_to_ptr.vmem [resolvable:$true] %s465_s3 }
  0x6f   : > { %s2186_s28 = scalar_lea.vmem %s466_s3, 256  ;;  %p2867_p9 = pneg %p2515_p1 }
  0x70   : > { %p2187_p6 = scmp.ne.s32.totalorder %s466_s3, %s2186_s28  ;;  %s2330_s15 = smov [#allocation2]  }
  0x71   : > { %s2191_s7 = sshll.u32 %s2330_s15, 4  ;;  %s2192_s7 = int_to_ptr.vmem [resolvable:$false] %s2191_s7 }
  0x72   : > { %p2189_p12 = pnand %p2187_p6, %p2867_p9  ;;  %s2193_s8 = scalar_lea.vmem %s2192_s7, 512 }
  0x73   : > { %p2194_p11 = scmp.lt.s32.totalorder %s466_s3, %s2192_s7  ;;  %p2195_p0 = scmp.lt.s32.totalorder %s2193_s8, %s2186_s28 }
  0x74   : > { %p2190_p13 = pneg %p2189_p12 }
  0x75   : > { %p2196_p10 = por %p2195_p0, %p2194_p11 }
  0x77   : > { %p2197_p5 = pnand %p2196_p10, %p2190_p13 }
  0x79   : > { %2200 = shalt.err (!%p2197_p5)
}
  0x7a   : > { %s2331_s13 = smov 128   ;;  %s2332_s22 = smov 8  }
  0x7b   : > { %1892 = dma.hbm_to_vmem [thread:$0]  (!%p2515_p1), %s464_s19, 256, %s466_s3, %s453_s21, %s2331_s13, %s2331_s13, %s2332_s22  }
  0x7c   : > { %s2214_s25 = scalar_lea.vmem %s2546_s30, 1024  ;;  %p2868_p3 = pmov %p2867_p9 }
  0x7d   : > { %p2215_p2 = scmp.ne.s32.totalorder %s2546_s30, %s2214_s25  ;;  %s2333_s24 = smov [#allocation7]  }
  0x7e   : > { %s2219_s17 = sshll.u32 %s2333_s24, 4  ;;  %s2220_s17 = int_to_ptr.vmem [resolvable:$false] %s2219_s17 }
  0x7f   : > { %p2217_p6 = pnand %p2215_p2, %p2868_p3  ;;  %s2221_s27 = scalar_lea.vmem %s2220_s17, 2048 }
  0x80   : > { %p2222_p12 = scmp.lt.s32.totalorder %s2546_s30, %s2220_s17  ;;  %p2223_p13 = scmp.lt.s32.totalorder %s2221_s27, %s2214_s25 }
  0x81   : > { %p2218_p9 = pneg %p2217_p6 }
  0x82   : > { %p2224_p11 = por %p2223_p13, %p2222_p12 }
  0x84   : > { %p2225_p0 = pnand %p2224_p11, %p2218_p9 }
  0x86   : > { %2228 = shalt.err (!%p2225_p0)
}
  0x87   : > { %1898 = dma.hbm_to_vmem [thread:$0]  (!%p2515_p1), %s2544_s1, 1024, %s2546_s30, %s2528_s10, %s2864_s12, %s2864_s12, %s2863_s9  }
  0x88   : > { %519 = sbr.rel (%p2459_p8) target bundleno = 2177 (0x881), region = 72  ;;  %s2598_s19 = sand.u32 (!%p2459_p8), 1, %s2305_s26  }
  0x89   : > { %s1607_s20 = sshll.u32 (!%p2459_p8), %s2598_s19, 4  ;;  %s522_s3 = scalar_lea.sflag (!%p2459_p8), [#allocation3], %s2598_s19 }
  0x8a   : > { %s525_s23 = scalar_lea.vmem (!%p2459_p8), [#allocation2], %s1607_s20 }
  0x8d   : > { %2280 = dma.done.wait (%p2449_p4), %s522_s3, 256  }
  0x8e   : > { %2282 = vsyncadd (%p2449_p4), %s522_s3, 4294967040  ;;  %s530_s1 = sand.u32 1, %s2440_s14   ;;  %s1608_s10 = sshll.u32 %s2598_s19, 6 }
  0x8f   : > { %s531_s30 = scalar_lea.sflag [#allocation6], %s530_s1  ;;  %s2610_s18 = scalar_lea.vmem [#allocation5], %s1608_s10 }
  0x90   : > { %2284 = dma.done.wait (%p2449_p4), %s531_s30, 2048  }
  0x91   : > { %2286 = vsyncadd (%p2449_p4), %s531_s30, 4294965248  ;;  %s2616_s9 = scalar_lea.vmem [#allocation7], %s1608_s10  ;;  %p2869_p1 = scmp.eq.s32.totalorder %s2440_s14, 0 }
  0x93   : > { %2288 = dma.done.wait (%p2869_p1), [#allocation9], 2048   ;;  %p2870_p8 = pmov %p2869_p1 }
  0x94   : > { %p2871_p10 = pmov %p2869_p1 }
  0x95   : > { %2290 = vsyncadd (%p2870_p8), [#allocation9], 4294965248 }
  0x96   : > { %2292 = dma.done.wait (%p2871_p10), [#allocation12], 2048   ;;  %p2872_p5 = pmov %p2869_p1 }
  0x97   : > { %v2626_v0 = vld [vmem:[%s525_s23] sm:$0xff]  ;;  %v2628_v1 = vld [vmem:[%s525_s23 + $0x8] sm:$0xff]  ;;  %v2334_v3 = vmov 0.0   ;;  %v649_v4 = vlaneseq  ;;  %vm2335_vm1 = vmmov 0   ;;  %s2873_s7 = sld [smem:[#allocation30_spill]]  ;;  %s611_s10 = scalar_lea.vmem [#allocation14], %s1607_s20 }
  0x98   : > { %2294 = vsyncadd (%p2872_p5), [#allocation12], 4294965248  ;;  %654 = vadd.xlane.f32.xlu0 %v2626_v0  ;;  %v1973_v2 = vld [vmem:[#allocation8 + $0x38] sm:$0xff]   ;;  %1732 = vmatprep.subr.bf16.mxu0 %v2334_v3  ;;  %v1974_v16 = vld [vmem:[#allocation8 + $0x30] sm:$0xff]   ;;  %s2874_s22 = sld [smem:[#allocation31_spill]]  ;;  %s1406_s20 = scalar_lea.sflag [#allocation4], %s2598_s19 }
  0x99   : > { %1752 = vmatprep.subr.bf16.mxu1 %v2334_v3  ;;  %1733 = vmatpush3.bf16.msra.mxu0 %v1973_v2  ;;  %v2635_v5 = vand.u32 127, %v649_v4  ;;  %v1975_v17 = vld [vmem:[#allocation8 + $0x28] sm:$0xff]   ;;  %v1976_v18 = vld [vmem:[#allocation8 + $0x20] sm:$0xff]   ;;  %v1977_v19 = vld [vmem:[#allocation8 + $0x18] sm:$0xff]   ;;  %s2875_s17 = sld [smem:[#allocation33_spill]]  ;;  %s2336_s15 = smov [#allocation14]  }
  0x9a   : > { %1734 = vmatprep.subr.bf16.mxu0 %v2334_v3  ;;  %1748 = vmatprep.mubr.msk.bf16.mxu0 %vm2335_vm1, %v2334_v3  ;;  %v1978_v20 = vld [vmem:[#allocation8 + $0x10] sm:$0xff]   ;;  %v1979_v21 = vld [vmem:[#allocation8 + $0x8] sm:$0xff]   ;;  %v1980_v22 = vld [vmem:[#allocation8] sm:$0xff]   ;;  %s2876_s27 = sld [smem:[#allocation22_spill]] }
  0x9b   : > { %vm651_vm0 = vcmp.lt.s32.totalorder %v2635_v5, 32  ;;  %1768 = vmatprep.mubr.msk.bf16.mxu1 %vm2335_vm1, %v2334_v3  ;;  %v1981_v23 = vld [vmem:[%s2610_s18 + $0x38] sm:$0xff]   ;;  %v1982_v24 = vld [vmem:[%s2610_s18 + $0x30] sm:$0xff]   ;;  %v1983_v25 = vld [vmem:[%s2610_s18 + $0x28] sm:$0xff]   ;;  %vm894_vm2 = vcmp.lt.s32.totalorder %v2635_v5, 8  ;;  %s2877_s1 = sld [smem:[#allocation34_spill]] }
  0x9c   : > { %656 = vadd.xlane.f32.xlu0 %v2628_v1  ;;  %1753 = vmatpush3.bf16.msra.mxu1 %v1981_v23  ;;  %v1984_v26 = vld [vmem:[%s2610_s18 + $0x20] sm:$0xff]   ;;  %v1985_v27 = vld [vmem:[%s2610_s18 + $0x18] sm:$0xff]   ;;  %v1986_v28 = vld [vmem:[%s2610_s18 + $0x10] sm:$0xff]   ;;  %s2879_s12 = sld [smem:[#allocation35_spill]] }
  0x9d   : > { %1735 = vmatpush3.bf16.msra.mxu0 %v1974_v16  ;;  %1754 = vmatprep.subr.bf16.mxu1 %v2334_v3  ;;  %v1615_v37 = vld [vmem:[%s2813_s5] ss:$0 sm:$0xff]  ;;  %v1987_v46 = vld [vmem:[%s2610_s18 + $0x8] sm:$0xff]   ;;  %v1989_v55 = vld [vmem:[%s2616_s9 + $0x38] sm:$0xff]  }
  0x9e   : > { %1736 = vmatprep.subr.bf16.mxu0 %v2334_v3  ;;  %v1616_v41 = vld [vmem:[%s2814_s6] ss:$0 sm:$0xff]  ;;  %v1990_v56 = vld [vmem:[%s2616_s9 + $0x30] sm:$0xff]   ;;  %v1991_v63 = vld [vmem:[%s2616_s9 + $0x28] sm:$0xff]  }
  0x9f   : > { %v1988_v47 = vld [vmem:[%s2610_s18] sm:$0xff]   ;;  %v1993_v4 = vld [vmem:[%s2616_s9 + $0x18] sm:$0xff]   ;;  %v2002_v23 = vld [vmem:[#allocation10 + $0x10] sm:$0xff]   ;;  %s1421_s18 = sshll.u32 %s611_s10, 4  ;;  %s2754_s18 = int_to_ptr.vmem [resolvable:$true] %s1421_s18 }
  0xa0   : > { %1755 = vmatpush3.bf16.msra.mxu1 %v1982_v24  ;;  %v1992_v2 = vld [vmem:[%s2616_s9 + $0x20] sm:$0xff]   ;;  %v2003_v24 = vld [vmem:[#allocation10 + $0x8] sm:$0xff]   ;;  %s2229_s28 = scalar_lea.vmem %s2754_s18, 256 }
  0xa1   : > { %1737 = vmatpush3.bf16.msra.mxu0 %v1975_v17  ;;  %1756 = vmatprep.subr.bf16.mxu1 %v2334_v3  ;;  %v2011_v5 = vld [vmem:[#allocation11 + $0x8] sm:$0xff]   ;;  %p2230_p4 = scmp.ne.s32.totalorder %s2754_s18, %s2229_s28 }
  0xa2   : > { %1738 = vmatprep.subr.bf16.mxu0 %v2334_v3 }
  0xa3   : > { %p2231_p2 = pnand %p2230_p4, %p2506_p7 }
  0xa4   : > { %1757 = vmatpush3.bf16.msra.mxu1 %v1983_v25  ;;  %v2004_v25 = vld [vmem:[#allocation10] sm:$0xff]  }
  0xa5   : > { %1739 = vmatpush3.bf16.msra.mxu0 %v1976_v18  ;;  %1758 = vmatprep.subr.bf16.mxu1 %v2334_v3  ;;  %v1997_v18 = vld [vmem:[#allocation10 + $0x38] sm:$0xff]   ;;  %p2232_p3 = pneg %p2231_p2 }
  0xa6   : > { %1740 = vmatprep.subr.bf16.mxu0 %v2334_v3 }
  0xa8   : > { %1759 = vmatpush3.bf16.msra.mxu1 %v1984_v26 }
  0xa9   : > { %1741 = vmatpush3.bf16.msra.mxu0 %v1977_v19  ;;  %1760 = vmatprep.subr.bf16.mxu1 %v2334_v3  ;;  %v1998_v19 = vld [vmem:[#allocation10 + $0x30] sm:$0xff]  }
  0xaa   : > { %1742 = vmatprep.subr.bf16.mxu0 %v2334_v3 }
  0xac   : > { %1761 = vmatpush3.bf16.msra.mxu1 %v1985_v27 }
  0xad   : > { %1743 = vmatpush3.bf16.msra.mxu0 %v1978_v20  ;;  %1762 = vmatprep.subr.bf16.mxu1 %v2334_v3  ;;  %v1999_v20 = vld [vmem:[#allocation10 + $0x28] sm:$0xff]  }
  0xae   : > { %1744 = vmatprep.subr.bf16.mxu0 %v2334_v3 }
  0xb0   : > { %1763 = vmatpush3.bf16.msra.mxu1 %v1986_v28 }
  0xb1   : > { %1745 = vmatpush3.bf16.msra.mxu0 %v1979_v21  ;;  %1764 = vmatprep.subr.bf16.mxu1 %v2334_v3  ;;  %v2000_v21 = vld [vmem:[#allocation10 + $0x20] sm:$0xff]  }
  0xb2   : > { %1746 = vmatprep.subr.bf16.mxu0 %v2334_v3 }
  0xb4   : > { %1765 = vmatpush3.bf16.msra.mxu1 %v1987_v46 }
  0xb5   : > { %1747 = vmatpush3.bf16.msra.mxu0 %v1980_v22  ;;  %1766 = vmatprep.subr.bf16.mxu1 %v2334_v3  ;;  %v2001_v22 = vld [vmem:[#allocation10 + $0x18] sm:$0xff]  }
  0xb6   : > { %1772 = vmatprep.subr.bf16.mxu0 %v2334_v3 }
  0xb8   : > { %1767 = vmatpush3.bf16.msra.mxu1 %v1988_v47 }
  0xb9   : > { %1792 = vmatprep.subr.bf16.mxu1 %v2334_v3 }
 0x121   : > { %v655_v6 = vpop.xlane.xlu0 %654 }
 0x122   : > { %v658_v7 = vmul.f32 0.03125, %v655_v6  ;;  %v1994_v6 = vld [vmem:[%s2616_s9 + $0x10] sm:$0xff]  }
 0x124   : > { %v660_v8 = vsub.f32 %v2626_v0, %v658_v7  ;;  %v1995_v7 = vld [vmem:[%s2616_s9 + $0x8] sm:$0xff]  }
 0x125   : > { %v657_v9 = vpop.xlane.xlu0 %656 }
 0x126   : > { %v659_v10 = vmul.f32 0.03125, %v657_v9  ;;  %v664_v11 = vsel %vm651_vm0, %v660_v8, 0.0  ;;  %v1996_v8 = vld [vmem:[%s2616_s9] sm:$0xff]   ;;  %s1677_s9 = sshll.u32 %s2876_s27, 8 }
 0x127   : > { %v666_v12 = vmul.f32 %v664_v11, %v664_v11  ;;  %s2760_s21 = scalar_lea.hbm %s2879_s12, %s1677_s9 }
 0x128   : > { %v661_v13 = vsub.f32 %v2628_v1, %v659_v10 }
 0x129   : > { %668 = vadd.xlane.f32.xlu1 %v666_v12 }
 0x12a   : > { %v665_v14 = vsel %vm651_vm0, %v661_v13, 0.0 }
 0x12b   : > { %v667_v15 = vmul.f32 %v665_v14, %v665_v14 }
 0x12d   : > { %670 = vadd.xlane.f32.xlu1 %v667_v15 }
 0x1b2   : > { %v669_v29 = vpop.xlane.xlu1 %668 }
 0x1b3   : > { %v672_v30 = vmul.f32 0.03125, %v669_v29 }
 0x1b5   : > { %v674_v31 = vadd.f32 1e-05, %v672_v30 }
 0x1b6   : > { %v671_v32 = vpop.xlane.xlu1 %670 }
 0x1b7   : > { %2021 = vrsqrt.f32 %v674_v31  ;;  %v673_v33 = vmul.f32 0.03125, %v671_v32 }
 0x1b9   : > { %v675_v34 = vadd.f32 1e-05, %v673_v33 }
 0x1bb   : > { %2023 = vrsqrt.f32 %v675_v34 }
 0x1c4   : > { %v2022_v35 = vpop.eup %2021 }
 0x1c5   : > { %v678_v36 = vmul.f32 %v2022_v35, %v664_v11 }
 0x1c7   : > { %v686_v40 = vmul.f32 %v1615_v37, %v678_v36 }
 0x1c8   : > { %v2024_v38 = vpop.eup %2023 }
 0x1c9   : > { %v679_v39 = vmul.f32 %v2024_v38, %v665_v14  ;;  %v694_v43 = vadd.f32 %v1616_v41, %v686_v40 }
 0x1cb   : > { %v687_v42 = vmul.f32 %v1615_v37, %v679_v39 }
 0x1cd   : > { %v695_v44 = vadd.f32 %v1616_v41, %v687_v42 }
 0x1cf   : > { %v696_v45 = vpack.c.bf16 %v695_v44, %v694_v43  ;;  %v2005_v43 = vld [vmem:[#allocation11 + $0x38] sm:$0xff]  }
 0x1d1   : > { %1749 = vmatmul.mubr.bf16.vlgmr.msra.gmra.mxu0 %v696_v45 }
 0x1d2   : > { %1788 = vmatprep.mubr.msk.bf16.mxu0 %vm2335_vm1, %v2334_v3  ;;  %1773 = vmatpush3.bf16.msra.mxu0 %v1989_v55  ;;  %v2009_v55 = vld [vmem:[#allocation11 + $0x18] sm:$0xff]  }
 0x1d3   : > { %1774 = vmatprep.subr.bf16.mxu0 %v2334_v3 }
 0x1d6   : > { %1775 = vmatpush3.bf16.msra.mxu0 %v1990_v56  ;;  %v2010_v56 = vld [vmem:[#allocation11 + $0x10] sm:$0xff]  }
 0x1d7   : > { %1776 = vmatprep.subr.bf16.mxu0 %v2334_v3 }
 0x1da   : > { %1777 = vmatpush3.bf16.msra.mxu0 %v1991_v63 }
 0x1db   : > { %1778 = vmatprep.subr.bf16.mxu0 %v2334_v3 }
 0x1de   : > { %1779 = vmatpush3.bf16.msra.mxu0 %v1992_v2 }
 0x1df   : > { %1780 = vmatprep.subr.bf16.mxu0 %v2334_v3 }
 0x1e2   : > { %1781 = vmatpush3.bf16.msra.mxu0 %v1993_v4 }
 0x1e3   : > { %1782 = vmatprep.subr.bf16.mxu0 %v2334_v3 }
 0x1e6   : > { %1783 = vmatpush3.bf16.msra.mxu0 %v1994_v6  ;;  %v1649_v6 = vld [vmem:[%s2873_s7] ss:$0 sm:$0xff]  ;;  %s2233_s7 = sshll.u32 %s2336_s15, 4  ;;  %s2234_s7 = int_to_ptr.vmem [resolvable:$false] %s2233_s7 }
 0x1e7   : > { %1784 = vmatprep.subr.bf16.mxu0 %v2334_v3  ;;  %s2235_s8 = scalar_lea.vmem %s2234_s7, 512  ;;  %p2236_p6 = scmp.lt.s32.totalorder %s2754_s18, %s2234_s7 }
 0x1e8   : > { %p2237_p9 = scmp.lt.s32.totalorder %s2235_s8, %s2229_s28 }
 0x1ea   : > { %1785 = vmatpush3.bf16.msra.mxu0 %v1995_v7  ;;  %p2238_p12 = por %p2237_p9, %p2236_p6 }
 0x1eb   : > { %1786 = vmatprep.subr.bf16.mxu0 %v2334_v3 }
 0x1ec   : > { %p2239_p13 = pnand %p2238_p12, %p2232_p3 }
 0x1ee   : > { %1787 = vmatpush3.bf16.msra.mxu0 %v1996_v8 }
 0x1ef   : > { %1812 = vmatprep.subr.bf16.mxu0 %v2334_v3 }
 0x291   : > { %v795_v48 = vpop.f32.mrf.mxu0 }
 0x292   : > { %v802_v51 = vmul.f32 0.17677669, %v795_v48 }
 0x293   : > { %v1750_v49 = vpop.f32.mrf.mxu0 }
 0x295   : > { %v798_v50 = vpop.f32.mrf.mxu0 }
 0x296   : > { %v803_v52 = vmul.f32 0.17677669, %v798_v50 }
 0x297   : > { %v1751_v53 = vpop.f32.mrf.mxu0 }
 0x298   : > { %v804_v54 = vpack.c.bf16 %v803_v52, %v802_v51  ;;  %v2006_v52 = vld [vmem:[#allocation11 + $0x30] sm:$0xff]   ;;  %v2007_v53 = vld [vmem:[#allocation11 + $0x28] sm:$0xff]  }
 0x29a   : > { %1769 = vmatmul.mubr.bf16.vlgmr.msra.gmra.mxu1 %v804_v54  ;;  %v2008_v54 = vld [vmem:[#allocation11 + $0x20] sm:$0xff]  }
 0x29b   : > { %1808 = vmatprep.mubr.msk.bf16.mxu1 %vm2335_vm1, %v2334_v3  ;;  %1793 = vmatpush3.bf16.msra.mxu1 %v1997_v18  ;;  %v2016_v18 = vld [vmem:[#allocation13 + $0x20] sm:$0xff]  }
 0x29c   : > { %1794 = vmatprep.subr.bf16.mxu1 %v2334_v3 }
 0x29f   : > { %1795 = vmatpush3.bf16.msra.mxu1 %v1998_v19  ;;  %v2017_v19 = vld [vmem:[#allocation13 + $0x18] sm:$0xff]  }
 0x2a0   : > { %1796 = vmatprep.subr.bf16.mxu1 %v2334_v3 }
 0x2a3   : > { %1797 = vmatpush3.bf16.msra.mxu1 %v1999_v20  ;;  %v2018_v20 = vld [vmem:[#allocation13 + $0x10] sm:$0xff]  }
 0x2a4   : > { %1798 = vmatprep.subr.bf16.mxu1 %v2334_v3 }
 0x2a7   : > { %1799 = vmatpush3.bf16.msra.mxu1 %v2000_v21  ;;  %v2019_v21 = vld [vmem:[#allocation13 + $0x8] sm:$0xff]  }
 0x2a8   : > { %1800 = vmatprep.subr.bf16.mxu1 %v2334_v3 }
 0x2ab   : > { %1801 = vmatpush3.bf16.msra.mxu1 %v2001_v22  ;;  %v2020_v22 = vld [vmem:[#allocation13] sm:$0xff]  }
 0x2ac   : > { %1802 = vmatprep.subr.bf16.mxu1 %v2334_v3 }
 0x2af   : > { %1803 = vmatpush3.bf16.msra.mxu1 %v2002_v23  ;;  %v1651_v23 = vld [vmem:[%s2875_s17] ss:$0 sm:$0xff] }
 0x2b0   : > { %1804 = vmatprep.subr.bf16.mxu1 %v2334_v3 }
 0x2b3   : > { %1805 = vmatpush3.bf16.msra.mxu1 %v2003_v24 }
 0x2b4   : > { %1806 = vmatprep.subr.bf16.mxu1 %v2334_v3 }
 0x2b7   : > { %1807 = vmatpush3.bf16.msra.mxu1 %v2004_v25 }
 0x2b8   : > { %1832 = vmatprep.subr.bf16.mxu1 %v2334_v3 }
 0x35a   : > { %v887_v57 = vpop.f32.mrf.mxu1 }
 0x35b   : > { %v895_v58 = vsel %vm894_vm2, %v887_v57, -1e+30  ;;  %v2012_v57 = vld [vmem:[#allocation11] sm:$0xff]  }
 0x35c   : > { %897 = vmax.xlane.f32.xlu0 %v895_v58  ;;  %v1770_v59 = vpop.f32.mrf.mxu1 }
 0x35e   : > { %v890_v60 = vpop.f32.mrf.mxu1 }
 0x35f   : > { %v896_v61 = vsel %vm894_vm2, %v890_v60, -1e+30 }
 0x360   : > { %899 = vmax.xlane.f32.xlu1 %v896_v61  ;;  %v1771_v62 = vpop.f32.mrf.mxu1 }
 0x3e5   : > { %v898_v9 = vpop.xlane.xlu0 %897 }
 0x3e6   : > { %v901_v10 = vsub.f32 %v895_v58, %v898_v9 }
 0x3e8   : > { %v903_v11 = vmul.f32 1.442695, %v901_v10  ;;  %v1650_v10 = vld [vmem:[%s2874_s22] ss:$0 sm:$0xff] }
 0x3e9   : > { %v900_v12 = vpop.xlane.xlu1 %899 }
 0x3ea   : > { %2025 = vpow2.f32 %v903_v11  ;;  %v902_v13 = vsub.f32 %v896_v61, %v900_v12 }
 0x3ec   : > { %v905_v14 = vmul.f32 1.442695, %v902_v13 }
 0x3ee   : > { %2027 = vpow2.f32 %v905_v14 }
 0x3f7   : > { %v2026_v15 = vpop.eup %2025 }
 0x3f8   : > { %907 = vadd.xlane.f32.xlu0 %v2026_v15 }
 0x3fb   : > { %v2028_v16 = vpop.eup %2027 }
 0x3fc   : > { %909 = vadd.xlane.f32.xlu1 %v2028_v16  ;;  %v911_v17 = vpack.c.bf16 %v2028_v16, %v2026_v15  ;;  %v2013_v15 = vld [vmem:[#allocation13 + $0x38] sm:$0xff]   ;;  %v2014_v16 = vld [vmem:[#allocation13 + $0x30] sm:$0xff]  }
 0x3fe   : > { %1789 = vmatmul.mubr.bf16.vlgmr.msra.gmra.mxu0 %v911_v17  ;;  %v2015_v17 = vld [vmem:[#allocation13 + $0x28] sm:$0xff]  }
 0x3ff   : > { %1828 = vmatprep.mubr.msk.bf16.mxu0 %vm2335_vm1, %v2334_v3  ;;  %1813 = vmatpush3.bf16.msra.mxu0 %v2005_v43 }
 0x400   : > { %1814 = vmatprep.subr.bf16.mxu0 %v2334_v3 }
 0x403   : > { %1815 = vmatpush3.bf16.msra.mxu0 %v2006_v52 }
 0x404   : > { %1816 = vmatprep.subr.bf16.mxu0 %v2334_v3 }
 0x407   : > { %1817 = vmatpush3.bf16.msra.mxu0 %v2007_v53 }
 0x408   : > { %1818 = vmatprep.subr.bf16.mxu0 %v2334_v3 }
 0x40b   : > { %1819 = vmatpush3.bf16.msra.mxu0 %v2008_v54 }
 0x40c   : > { %1820 = vmatprep.subr.bf16.mxu0 %v2334_v3 }
 0x40f   : > { %1821 = vmatpush3.bf16.msra.mxu0 %v2009_v55 }
 0x410   : > { %1822 = vmatprep.subr.bf16.mxu0 %v2334_v3 }
 0x413   : > { %1823 = vmatpush3.bf16.msra.mxu0 %v2010_v56 }
 0x414   : > { %1824 = vmatprep.subr.bf16.mxu0 %v2334_v3 }
 0x417   : > { %1825 = vmatpush3.bf16.msra.mxu0 %v2011_v5 }
 0x418   : > { %1826 = vmatprep.subr.bf16.mxu0 %v2334_v3 }
 0x41b   : > { %1827 = vmatpush3.bf16.msra.mxu0 %v2012_v57 }
 0x481   : > { %v908_v26 = vpop.xlane.xlu0 %907 }
 0x482   : > { %2029 = vrcp.f32 %v908_v26 }
 0x485   : > { %v910_v27 = vpop.xlane.xlu1 %909 }
 0x486   : > { %2031 = vrcp.f32 %v910_v27 }
 0x48f   : > { %v2030_v30 = vpop.eup %2029 }
 0x493   : > { %v2032_v31 = vpop.eup %2031 }
 0x4be   : > { %v994_v28 = vpop.f32.mrf.mxu0 }
 0x4bf   : > { %v1003_v33 = vmul.f32 %v2030_v30, %v994_v28 }
 0x4c0   : > { %v1790_v29 = vpop.f32.mrf.mxu0 }
 0x4c2   : > { %v997_v32 = vpop.f32.mrf.mxu0 }
 0x4c3   : > { %v1004_v34 = vmul.f32 %v2032_v31, %v997_v32 }
 0x4c4   : > { %v1791_v35 = vpop.f32.mrf.mxu0 }
 0x4c5   : > { %v1005_v36 = vpack.c.bf16 %v1004_v34, %v1003_v33 }
 0x4c7   : > { %1809 = vmatmul.mubr.bf16.vlgmr.msra.gmra.mxu1 %v1005_v36 }
 0x4c8   : > { %1848 = vmatprep.mubr.msk.bf16.mxu1 %vm2335_vm1, %v2334_v3  ;;  %1833 = vmatpush3.bf16.msra.mxu1 %v2013_v15 }
 0x4c9   : > { %1834 = vmatprep.subr.bf16.mxu1 %v2334_v3 }
 0x4cc   : > { %1835 = vmatpush3.bf16.msra.mxu1 %v2014_v16 }
 0x4cd   : > { %1836 = vmatprep.subr.bf16.mxu1 %v2334_v3 }
 0x4d0   : > { %1837 = vmatpush3.bf16.msra.mxu1 %v2015_v17 }
 0x4d1   : > { %1838 = vmatprep.subr.bf16.mxu1 %v2334_v3 }
 0x4d4   : > { %1839 = vmatpush3.bf16.msra.mxu1 %v2016_v18 }
 0x4d5   : > { %1840 = vmatprep.subr.bf16.mxu1 %v2334_v3 }
 0x4d8   : > { %1841 = vmatpush3.bf16.msra.mxu1 %v2017_v19 }
 0x4d9   : > { %1842 = vmatprep.subr.bf16.mxu1 %v2334_v3 }
 0x4dc   : > { %1843 = vmatpush3.bf16.msra.mxu1 %v2018_v20 }
 0x4dd   : > { %1844 = vmatprep.subr.bf16.mxu1 %v2334_v3 }
 0x4e0   : > { %1845 = vmatpush3.bf16.msra.mxu1 %v2019_v21 }
 0x4e1   : > { %1846 = vmatprep.subr.bf16.mxu1 %v2334_v3 }
 0x4e4   : > { %1847 = vmatpush3.bf16.msra.mxu1 %v2020_v22 }
 0x587   : > { %v1104_v37 = vpop.f32.mrf.mxu1 }
 0x588   : > { %v2711_v38 = vadd.f32 %v1104_v37, %v2626_v0 }
 0x589   : > { %v1810_v39 = vpop.f32.mrf.mxu1 }
 0x58a   : > { %1115 = vadd.xlane.f32.xlu0 %v2711_v38 }
 0x58b   : > { %v1107_v40 = vpop.f32.mrf.mxu1 }
 0x58c   : > { %v2715_v41 = vadd.f32 %v1107_v40, %v2628_v1 }
 0x58d   : > { %v1811_v42 = vpop.f32.mrf.mxu1 }
 0x58e   : > { %1117 = vadd.xlane.f32.xlu1 %v2715_v41 }
 0x613   : > { %v1116_v44 = vpop.xlane.xlu0 %1115 }
 0x614   : > { %v1119_v45 = vmul.f32 0.03125, %v1116_v44 }
 0x616   : > { %v1121_v46 = vsub.f32 %v2711_v38, %v1119_v45 }
 0x617   : > { %v1118_v0 = vpop.xlane.xlu1 %1117 }
 0x618   : > { %v1120_v47 = vmul.f32 0.03125, %v1118_v0  ;;  %v1123_v48 = vsel %vm651_vm0, %v1121_v46, 0.0 }
 0x619   : > { %v1125_v49 = vmul.f32 %v1123_v48, %v1123_v48 }
 0x61a   : > { %v1122_v1 = vsub.f32 %v2715_v41, %v1120_v47 }
 0x61b   : > { %1127 = vadd.xlane.f32.xlu0 %v1125_v49 }
 0x61c   : > { %v1124_v50 = vsel %vm651_vm0, %v1122_v1, 0.0  ;;  %v1668_v1 = vld [vmem:[%s2877_s1] ss:$0 sm:$0xff] }
 0x61d   : > { %v1126_v51 = vmul.f32 %v1124_v50, %v1124_v50 }
 0x61f   : > { %1129 = vadd.xlane.f32.xlu1 %v1126_v51 }
 0x6a4   : > { %v1128_v58 = vpop.xlane.xlu0 %1127 }
 0x6a5   : > { %v1131_v59 = vmul.f32 0.03125, %v1128_v58 }
 0x6a7   : > { %v1133_v60 = vadd.f32 1e-05, %v1131_v59 }
 0x6a8   : > { %v1130_v61 = vpop.xlane.xlu1 %1129 }
 0x6a9   : > { %2033 = vrsqrt.f32 %v1133_v60  ;;  %v1132_v62 = vmul.f32 0.03125, %v1130_v61 }
 0x6ab   : > { %v1134_v63 = vadd.f32 1e-05, %v1132_v62 }
 0x6ad   : > { %2035 = vrsqrt.f32 %v1134_v63 }
 0x6b6   : > { %v2034_v2 = vpop.eup %2033 }
 0x6b7   : > { %v1137_v4 = vmul.f32 %v2034_v2, %v1123_v48 }
 0x6b9   : > { %v1145_v9 = vmul.f32 %v1649_v6, %v1137_v4 }
 0x6ba   : > { %v2036_v7 = vpop.eup %2035 }
 0x6bb   : > { %v1138_v8 = vmul.f32 %v2036_v7, %v1124_v50  ;;  %v1153_v12 = vadd.f32 %v1650_v10, %v1145_v9 }
 0x6bd   : > { %v1146_v11 = vmul.f32 %v1649_v6, %v1138_v8 }
 0x6bf   : > { %v1154_v13 = vadd.f32 %v1650_v10, %v1146_v11 }
 0x6c1   : > { %v1155_v14 = vpack.c.bf16 %v1154_v13, %v1153_v12 }
 0x6c3   : > { %1829 = vmatmul.mubr.bf16.vlgmr.msra.gmra.mxu0 %v1155_v14 }
 0x783   : > { %v1261_v24 = vpop.f32.mrf.mxu0 }
 0x784   : > { %v1262_v25 = vadd.f32 %v1651_v23, %v1261_v24 }
 0x785   : > { %v1830_v26 = vpop.f32.mrf.mxu0 }
 0x786   : > { %v1268_v27 = vmul.f32 %v1262_v25, %v1262_v25 }
 0x787   : > { %v1264_v28 = vpop.f32.mrf.mxu0 }
 0x788   : > { %v1270_v29 = vmul.f32 %v1268_v27, %v1262_v25  ;;  %v1265_v30 = vadd.f32 %v1651_v23, %v1264_v28 }
 0x789   : > { %v1831_v31 = vpop.f32.mrf.mxu0 }
 0x78a   : > { %v1272_v32 = vmul.f32 0.044715, %v1270_v29  ;;  %v1269_v33 = vmul.f32 %v1265_v30, %v1265_v30 }
 0x78c   : > { %v1274_v34 = vadd.f32 %v1272_v32, %v1262_v25  ;;  %v1271_v35 = vmul.f32 %v1269_v33, %v1265_v30 }
 0x78e   : > { %v1276_v36 = vmul.f32 0.7978846, %v1274_v34  ;;  %v1273_v3 = vmul.f32 0.044715, %v1271_v35 }
 0x790   : > { %2037 = vtanh.f32 %v1276_v36  ;;  %v1275_v37 = vadd.f32 %v1273_v3, %v1265_v30 }
 0x792   : > { %v1277_v39 = vmul.f32 0.7978846, %v1275_v37 }
 0x794   : > { %2039 = vtanh.f32 %v1277_v39 }
 0x79d   : > { %v2038_v40 = vpop.eup %2037 }
 0x79e   : > { %v1280_v42 = vadd.f32 1.0, %v2038_v40 }
 0x7a0   : > { %v1282_v44 = vmul.f32 0.5, %v1280_v42 }
 0x7a1   : > { %v2040_v43 = vpop.eup %2039 }
 0x7a2   : > { %v1281_v45 = vadd.f32 1.0, %v2040_v43  ;;  %v1284_v0 = vmul.f32 %v1282_v44, %v1262_v25 }
 0x7a4   : > { %v1283_v46 = vmul.f32 0.5, %v1281_v45 }
 0x7a6   : > { %v1285_v47 = vmul.f32 %v1283_v46, %v1265_v30 }
 0x7a8   : > { %v1286_v48 = vpack.c.bf16 %v1285_v47, %v1284_v0 }
 0x7aa   : > { %1849 = vmatmul.mubr.bf16.vlgmr.msra.gmra.mxu1 %v1286_v48 }
 0x86a   : > { %v1385_v49 = vpop.f32.mrf.mxu1 }
 0x86b   : > { %v1392_v50 = vadd.f32 %v1385_v49, %v2711_v38 }
 0x86c   : > { %v1850_v51 = vpop.f32.mrf.mxu1 }
 0x86d   : > { %v1401_v52 = vadd.f32 %v1668_v1, %v1392_v50 }
 0x86e   : > { %v1388_v53 = vpop.f32.mrf.mxu1 }
 0x86f   : > { %1403 = vst [vmem:[%s611_s10] sm:$0xff] %v1401_v52  ;;  %v1393_v54 = vadd.f32 %v1388_v53, %v2715_v41 }
 0x870   : > { %v1851_v55 = vpop.f32.mrf.mxu1 }
 0x871   : > { %v1402_v38 = vadd.f32 %v1668_v1, %v1393_v54 }
 0x873   : > { %1404 = vst [vmem:[%s611_s10 + $0x8] sm:$0xff] %v1402_v38 }
 0x874   : > { %2242 = shalt.err (!%p2239_p13)
}
 0x875   : > { %s2243_s13 = scalar_lea.hbm %s2760_s21, 256  ;;  %s2247_s24 = scalar_lea.hbm %s2879_s12, 512 }
 0x876   : > { %p2244_p11 = scmp.ne.s32.totalorder %s2760_s21, %s2243_s13  ;;  %p2248_p8 = scmp.lt.s32.totalorder %s2760_s21, %s2879_s12 }
 0x877   : > { %p2249_p10 = scmp.lt.s32.totalorder %s2247_s24, %s2243_s13 }
 0x878   : > { %p2245_p0 = pnand %p2244_p11, %p2506_p7 }
 0x879   : > { %p2250_p5 = por %p2249_p10, %p2248_p8 }
 0x87a   : > { %p2246_p1 = pneg %p2245_p0 }
 0x87c   : > { %p2251_p4 = pnand %p2250_p5, %p2246_p1 }
 0x87e   : > { %2254 = shalt.err (!%p2251_p4)
}
 0x87f   : > { %s2337_s3 = smov 128   ;;  %s2338_s23 = smov 8  }
 0x880   : > { %1874 = dma.vmem_to_hbm [thread:$0]  (%p2506_p7), %s2754_s18, 256, %s2760_s21, %s1406_s20, %s2337_s3, %s2337_s3, %s2338_s23  }
 0x881 PF: > { %s2880_s1 = sld [smem:[#allocation20_spill]] }
 0x882   : > { %s2881_s10 = sld [smem:[#allocation24_spill]] }
 0x883   : > { %s2882_s9 = sld [smem:[#allocation23_spill]] }
 0x887   : > { %s1436_s14 = sand.u32 1, %s2880_s1  }
 0x888   : > { %p2883_p2 = scmp.ne.s32.totalorder %s2881_s10, 0  ;;  %s1437_s16 = scalar_lea.sflag [#allocation4], %s1436_s14 }
 0x889   : > { %p2884_p3 = scmp.ge.s32.totalorder %s2882_s9, 2 }
 0x88b   : > { %p1900_p6 = pnand %p2884_p3, %p2883_p2 }
 0x88d   : > { %p1901_p9 = pneg %p1900_p6 }
 0x88f   : > { %2296 = dma.done.wait (%p1901_p9), %s1437_s16, 256  }
 0x890   : > { %2298 = vsyncadd (%p1901_p9), %s1437_s16, 4294967040  ;;  %s34_s30 = sadd.s32 1, %s2882_s9   ;;  %s2885_s28 = sld [smem:[#allocation21_spill]] }
 0x891   : > { %p31_p12 = scmp.ge.s32.totalorder %s34_s30, 4   ;;  %s2886_s27 = sld [smem:[#allocation27_spill]] }
 0x892   : > { %s2887_s19 = sld [smem:[#allocation25_spill]]  ;;  %s2888_s25 = smov %s2305_s26 }
 0x894   :  { %33 = sbr.rel (!%p31_p12) target bundleno = 19 (0x13), region = 157 }
 0x896   : > { %s2889_s26 = smov %s2885_s28  ;;  %s2890_s28 = smov %s2317_s29 }
 0x898   : > { %s2891_s29 = smov %s2887_s19 }
 0x899   :  { %1442 = vsyncpa [#allocation3], 1 }
 0x89a   :  { %1444 = vsyncpa [#allocation3 + $0x1], 1 }
 0x89b   :  { %1445 = vsyncpa [#allocation6], 1 }
 0x89c   :  { %1447 = vsyncpa [#allocation6 + $0x1], 1 }
 0x89d   :  { %1448 = vsyncpa [#allocation9], 1 }
 0x89e   :  { %1449 = vsyncpa [#allocation12], 1 }
 0x89f   :  { %1450 = vsyncpa [#allocation4], 1 }
 0x8a0   :  { %1452 = vsyncpa [#allocation4 + $0x1], 1 }

</bundles_post_ra>
